<compile_context>
chip_gen: v5e
topology: v5e:2x2
jax: 0.10.0
libtpu: 0.0.40
codegen_flags: <defaults>
</compile_context>

<pallas_src>
import jax
import jax.numpy as jnp
from jax.experimental import pallas as pl
from jax.experimental.pallas import tpu as pltpu


def encoder_kernel(u_ref, xt_ref,
                   wwh_ref, wwc_ref, bw_ref, wv_ref,
                   wgx_ref, wgh_ref, bg_ref,
                   xt_out_ref, h_out_ref):
    B, V, W = u_ref.shape
    H = wgh_ref.shape[0]
    H4 = wgh_ref.shape[1]

    # --- hoisted loop invariants ---
    u_out = u_ref[...]                                   # (B, V, W) f32
    wv_b = wv_ref[...].reshape(1, 1, W)                  # (1, 1, W)
    bw_b = jnp.broadcast_to(bw_ref[...], (B, W))         # (B, W)
    bg_b = jnp.broadcast_to(bg_ref[...], (B, H4))        # (B, 4H)
    ww_h = wwh_ref[...]                                  # (H, W)   bf16
    ww_c = wwc_ref[...]                                  # (H, W)   bf16
    wg_x = wgx_ref[...]                                  # (V, 4H)  bf16
    wg_h = wgh_ref[...]                                  # (H, 4H)  bf16

    # --- recurrent state lives in vregs ---
    h = jnp.zeros((B, H), jnp.float32)
    c = jnp.zeros((B, H), jnp.float32)

    x_tildes = []
    hs = []
    for i in range(W):                       # fully unrolled, static indices
        h_bf = h.astype(jnp.bfloat16)
        c_bf = c.astype(jnp.bfloat16)

        # Recurrent half of the LSTM gate matmul, issued first so its MXU
        # latency hides under the attention/softmax chain of this step.
        gates_h = jnp.dot(h_bf, wg_h, preferred_element_type=jnp.float32)

        # Input attention: split matmul (no concat relayout).
        # Note: at M=B=2, N=W=8 the MXU is <1% utilized; a VPU MAC chain over K
        # could be competitive -- kept on the MXU here (bf16 operands).
        w_out = (jnp.dot(h_bf, ww_h, preferred_element_type=jnp.float32)
                 + jnp.dot(c_bf, ww_c, preferred_element_type=jnp.float32)
                 + bw_b)                                  # (B, W)
        t = jnp.tanh(w_out[:, None, :] + u_out)          # (B, V, W)
        scores = jnp.sum(t * wv_b, axis=-1)               # (B, V)

        # No max-subtraction: |scores| <= ||w_v||_1 (tanh-bounded), exp is safe
        # for moderate w_v; saves an XLU max + broadcast + subtract per step.
        e = jnp.exp(scores)
        x_i = xt_ref[i]                                    # (B, V) == x[:, :, i]
        ex = e * x_i                                       # unnormalized x_tilde

        # Push the unnormalized gate matmul immediately; the per-row softmax
        # scale commutes through the matmul, so normalize the popped result.
        gates_x_raw = jnp.dot(ex.astype(jnp.bfloat16), wg_x,
                              preferred_element_type=jnp.float32)  # (B, 4H)
        r = pl.reciprocal(jnp.sum(e, axis=1, keepdims=True),
                          approx=True)                     # (B, 1)
        x_tilde = r * ex                                   # (B, V)
        gates = r * gates_x_raw + gates_h + bg_b           # (B, 4H)

        # PyTorch LSTM gate order: i, f, g, o.
        if H4 <= 128:
            # one vreg per pass -> two full-width EUP pushes
            sig = jax.nn.sigmoid(gates)
            th = jnp.tanh(gates)
            i_g = sig[:, 0:H]
            f_g = sig[:, H:2 * H]
            g_g = th[:, 2 * H:3 * H]
            o_g = sig[:, 3 * H:4 * H]
        else:
            # only generate the EUP results we use
            i_g = jax.nn.sigmoid(gates[:, 0:H])
            f_g = jax.nn.sigmoid(gates[:, H:2 * H])
            g_g = jnp.tanh(gates[:, 2 * H:3 * H])
            o_g = jax.nn.sigmoid(gates[:, 3 * H:4 * H])

        c = f_g * c + i_g * g_g
        h = o_g * jnp.tanh(c)

        x_tildes.append(x_tilde)
        hs.append(h)

    # --- lane-dense single stores (no per-step masked writes, no W-way stack) ---
    xt_out_ref[...] = jnp.concatenate(x_tildes, axis=1)   # (B, W*V)
    h_out_ref[...] = jnp.concatenate(hs, axis=1)          # (B, W*H)


def encoder_forward(x, params):
    """x: (B, V, W) float32.  Returns (x_tilde_stack (W,B,V), h_stack (W,B,H))."""
    B, V, W = x.shape
    H = params['w_hh'].shape[1]

    # One-shot pre-step (off the recurrent critical path): u_out = linear_u(x).
    u_out = jnp.einsum('bvw,uw->bvu', x, params['w_u']) + params['b_u']  # (B,V,W)
    u_out = u_out.astype(jnp.float32)

    # Per-timestep slice x[:, :, i] becomes a cheap leading-axis load.
    x_t = jnp.transpose(x, (2, 0, 1))                                    # (W, B, V)

    # Pre-split / pre-transpose / pre-cast weights so the kernel only does
    # row-major bf16 matmuls with f32 accumulation.
    bf = jnp.bfloat16
    ww_h = params['w_w'][:, :H].T.astype(bf)              # (H, W)
    ww_c = params['w_w'][:, H:].T.astype(bf)              # (H, W)
    bw = params['b_w'].reshape(1, W).astype(jnp.float32)
    wv = params['w_v'].reshape(1, W).astype(jnp.float32)
    wg_x = params['w_ih'].T.astype(bf)                    # (V, 4H)
    wg_h = params['w_hh'].T.astype(bf)                    # (H, 4H)
    bg = (params['b_ih'] + params['b_hh']).reshape(1, 4 * H).astype(jnp.float32)

    vmem = pl.BlockSpec(memory_space=pltpu.MemorySpace.VMEM)
    xt_cat, h_cat = pl.pallas_call(
        encoder_kernel,
        out_shape=(jax.ShapeDtypeStruct((B, W * V), jnp.float32),
                   jax.ShapeDtypeStruct((B, W * H), jnp.float32)),
        in_specs=[vmem] * 9,
        out_specs=(vmem, vmem),
    )(u_out, x_t, ww_h, ww_c, bw, wv, wg_x, wg_h, bg)

    # Layout plumbing back to the PyTorch output convention (W, B, ...).
    x_tilde_stack = jnp.transpose(xt_cat.reshape(B, W, V), (1, 0, 2))
    h_stack = jnp.transpose(h_cat.reshape(B, W, H), (1, 0, 2))
    return x_tilde_stack, h_stack


def encoder_reference(x, params):
    """Pure-JAX mirror of the PyTorch forward (for correctness checking)."""
    B, V, W = x.shape
    H = params['w_hh'].shape[1]
    u_out = jnp.einsum('bvw,uw->bvu', x, params['w_u']) + params['b_u']
    h = jnp.zeros((B, H), jnp.float32)
    c = jnp.zeros((B, H), jnp.float32)
    x_tildes, hs = [], []
    for i in range(W):
        hc = jnp.concatenate([h, c], axis=1)
        w_out = hc @ params['w_w'].T + params['b_w']
        t = jnp.tanh(w_out[:, None, :] + u_out)
        scores = jnp.einsum('bvw,ow->bvo', t, params['w_v'])[..., 0]
        alpha = jax.nn.softmax(scores, axis=1)
        x_tilde = alpha * x[:, :, i]
        gates = (x_tilde @ params['w_ih'].T + params['b_ih']
                 + h @ params['w_hh'].T + params['b_hh'])
        i_g = jax.nn.sigmoid(gates[:, 0:H])
        f_g = jax.nn.sigmoid(gates[:, H:2 * H])
        g_g = jnp.tanh(gates[:, 2 * H:3 * H])
        o_g = jax.nn.sigmoid(gates[:, 3 * H:4 * H])
        c = f_g * c + i_g * g_g
        h = o_g * jnp.tanh(c)
        x_tildes.append(x_tilde)
        hs.append(h)
    return jnp.stack(x_tildes), jnp.stack(hs)


def init_params(key, num_variables, window, hidden_size):
    ks = jax.random.split(key, 9)
    s = 0.1
    return {
        # nn.LSTM(num_variables, hidden_size): weight_ih (4H, V), weight_hh (4H, H)
        'w_ih': s * jax.random.normal(ks[0], (4 * hidden_size, num_variables), jnp.float32),
        'w_hh': s * jax.random.normal(ks[1], (4 * hidden_size, hidden_size), jnp.float32),
        'b_ih': s * jax.random.normal(ks[2], (4 * hidden_size,), jnp.float32),
        'b_hh': s * jax.random.normal(ks[3], (4 * hidden_size,), jnp.float32),
        # linear_v: Linear(window, 1, bias=False) -> weight (1, window)
        'w_v': s * jax.random.normal(ks[4], (1, window), jnp.float32),
        # linear_w: Linear(2*hidden, window) -> weight (window, 2*hidden)
        'w_w': s * jax.random.normal(ks[5], (window, 2 * hidden_size), jnp.float32),
        'b_w': s * jax.random.normal(ks[6], (window,), jnp.float32),
        # linear_u: Linear(window, window) -> weight (window, window)
        'w_u': s * jax.random.normal(ks[7], (window, window), jnp.float32),
        'b_u': s * jax.random.normal(ks[8], (window,), jnp.float32),
    }


if __name__ == "__main__":
    batch, num_variables, window, hidden = 2, 4, 8, 32
    key = jax.random.PRNGKey(0)
    kx, kp = jax.random.split(key)
    x = jax.random.normal(kx, (batch, num_variables, window), jnp.float32)
    params = init_params(kp, num_variables, window, hidden)

    x_tilde_k, h_k = encoder_forward(x, params)
    jax.block_until_ready((x_tilde_k, h_k))

    x_tilde_r, h_r = encoder_reference(x, params)
    assert x_tilde_k.shape == (window, batch, num_variables)
    assert h_k.shape == (window, batch, hidden)
    # Tolerance covers the deliberate precision tradeoffs from the perf review:
    # bf16 MXU operands (f32 accumulation) + pl.reciprocal(approx=True) softmax.
    assert jnp.allclose(x_tilde_k, x_tilde_r, atol=2e-2, rtol=1e-2), "x_tilde mismatch"
    assert jnp.allclose(h_k, h_r, atol=2e-2, rtol=1e-2), "h mismatch"

    print("KERNEL_OK")
</pallas_src>

<mosaic_0001>
module attributes {stable_mosaic.version = 11 : i64} {
  func.func @encoder_kernel(%arg0: memref<2x4x8xf32, #tpu.memory_space<vmem>>, %arg1: memref<8x2x4xf32, #tpu.memory_space<vmem>>, %arg2: memref<32x8xbf16, #tpu.memory_space<vmem>>, %arg3: memref<32x8xbf16, #tpu.memory_space<vmem>>, %arg4: memref<1x8xf32, #tpu.memory_space<vmem>>, %arg5: memref<1x8xf32, #tpu.memory_space<vmem>>, %arg6: memref<4x128xbf16, #tpu.memory_space<vmem>>, %arg7: memref<32x128xbf16, #tpu.memory_space<vmem>>, %arg8: memref<1x128xf32, #tpu.memory_space<vmem>>, %arg9: memref<2x32xf32, #tpu.memory_space<vmem>>, %arg10: memref<2x256xf32, #tpu.memory_space<vmem>>) attributes {dimension_semantics = [], scalar_prefetch = 0 : i64, scratch_operands = 0 : i64, tpu.core_type = #tpu.core_type<tc>} {
    %c0 = arith.constant 0 : index
    %c0_0 = arith.constant 0 : index
    %c0_1 = arith.constant 0 : index
    %0 = vector.load %arg0[%c0, %c0_0, %c0_1] : memref<2x4x8xf32, #tpu.memory_space<vmem>>, vector<2x4x8xf32>
    %c0_2 = arith.constant 0 : index
    %c0_3 = arith.constant 0 : index
    %1 = vector.load %arg5[%c0_2, %c0_3] : memref<1x8xf32, #tpu.memory_space<vmem>>, vector<1x8xf32>
    %2 = vector.shape_cast %1 : vector<1x8xf32> to vector<1x1x8xf32>
    %c0_4 = arith.constant 0 : index
    %c0_5 = arith.constant 0 : index
    %3 = vector.load %arg4[%c0_4, %c0_5] : memref<1x8xf32, #tpu.memory_space<vmem>>, vector<1x8xf32>
    %4 = vector.shape_cast %3 : vector<1x8xf32> to vector<1x8xf32>
    %5 = vector.broadcast %4 : vector<1x8xf32> to vector<2x8xf32>
    %c0_6 = arith.constant 0 : index
    %c0_7 = arith.constant 0 : index
    %6 = vector.load %arg8[%c0_6, %c0_7] : memref<1x128xf32, #tpu.memory_space<vmem>>, vector<1x128xf32>
    %7 = vector.shape_cast %6 : vector<1x128xf32> to vector<1x128xf32>
    %8 = vector.broadcast %7 : vector<1x128xf32> to vector<2x128xf32>
    %c0_8 = arith.constant 0 : index
    %c0_9 = arith.constant 0 : index
    %9 = vector.load %arg2[%c0_8, %c0_9] : memref<32x8xbf16, #tpu.memory_space<vmem>>, vector<32x8xbf16>
    %c0_10 = arith.constant 0 : index
    %c0_11 = arith.constant 0 : index
    %10 = vector.load %arg3[%c0_10, %c0_11] : memref<32x8xbf16, #tpu.memory_space<vmem>>, vector<32x8xbf16>
    %c0_12 = arith.constant 0 : index
    %c0_13 = arith.constant 0 : index
    %11 = vector.load %arg6[%c0_12, %c0_13] : memref<4x128xbf16, #tpu.memory_space<vmem>>, vector<4x128xbf16>
    %c0_14 = arith.constant 0 : index
    %c0_15 = arith.constant 0 : index
    %12 = vector.load %arg7[%c0_14, %c0_15] : memref<32x128xbf16, #tpu.memory_space<vmem>>, vector<32x128xbf16>
    %cst = arith.constant 0.000000e+00 : f32
    %13 = vector.broadcast %cst : f32 to vector<2x32xf32>
    %cst_16 = arith.constant 0.000000e+00 : f32
    %14 = vector.broadcast %cst_16 : f32 to vector<2x32xf32>
    %15 = arith.truncf %13 : vector<2x32xf32> to vector<2x32xbf16>
    %16 = arith.truncf %14 : vector<2x32xf32> to vector<2x32xbf16>
    %cst_17 = arith.constant dense<0.000000e+00> : vector<2x128xf32>
    %17 = tpu.matmul %15, %12, %cst_17 {dimension_numbers = #tpu.dot_dimension_numbers<[1], [0], [0], [1], [0, 0, 1, 1], [], []>} : vector<2x32xbf16>, vector<32x128xbf16>, vector<2x128xf32> -> vector<2x128xf32>
    %cst_18 = arith.constant dense<0.000000e+00> : vector<2x8xf32>
    %18 = tpu.matmul %15, %9, %cst_18 {dimension_numbers = #tpu.dot_dimension_numbers<[1], [0], [0], [1], [0, 0, 1, 1], [], []>} : vector<2x32xbf16>, vector<32x8xbf16>, vector<2x8xf32> -> vector<2x8xf32>
    %cst_19 = arith.constant dense<0.000000e+00> : vector<2x8xf32>
    %19 = tpu.matmul %16, %10, %cst_19 {dimension_numbers = #tpu.dot_dimension_numbers<[1], [0], [0], [1], [0, 0, 1, 1], [], []>} : vector<2x32xbf16>, vector<32x8xbf16>, vector<2x8xf32> -> vector<2x8xf32>
    %20 = arith.addf %18, %19 : vector<2x8xf32>
    %21 = arith.addf %20, %5 : vector<2x8xf32>
    %22 = vector.shape_cast %21 : vector<2x8xf32> to vector<2x1x8xf32>
    %23 = vector.broadcast %22 : vector<2x1x8xf32> to vector<2x4x8xf32>
    %24 = arith.addf %23, %0 : vector<2x4x8xf32>
    %25 = math.tanh %24 : vector<2x4x8xf32>
    %26 = vector.broadcast %2 : vector<1x1x8xf32> to vector<2x4x8xf32>
    %27 = arith.mulf %25, %26 : vector<2x4x8xf32>
    %cst_20 = arith.constant dense<0.000000e+00> : vector<2x4xf32>
    %28 = vector.multi_reduction <add>, %27, %cst_20 [2] : vector<2x4x8xf32> to vector<2x4xf32>
    %29 = math.exp %28 : vector<2x4xf32>
    %c0_21 = arith.constant 0 : index
    %c0_22 = arith.constant 0 : index
    %c0_23 = arith.constant 0 : index
    %30 = vector.load %arg1[%c0_21, %c0_22, %c0_23] : memref<8x2x4xf32, #tpu.memory_space<vmem>>, vector<1x2x4xf32>
    %31 = vector.shape_cast %30 : vector<1x2x4xf32> to vector<2x4xf32>
    %32 = arith.mulf %29, %31 : vector<2x4xf32>
    %33 = arith.truncf %32 : vector<2x4xf32> to vector<2x4xbf16>
    %cst_24 = arith.constant dense<0.000000e+00> : vector<2x128xf32>
    %34 = tpu.matmul %33, %11, %cst_24 {dimension_numbers = #tpu.dot_dimension_numbers<[1], [0], [0], [1], [0, 0, 1, 1], [], []>} : vector<2x4xbf16>, vector<4x128xbf16>, vector<2x128xf32> -> vector<2x128xf32>
    %cst_25 = arith.constant dense<0.000000e+00> : vector<2xf32>
    %35 = vector.multi_reduction <add>, %29, %cst_25 [1] : vector<2x4xf32> to vector<2xf32>
    %36 = vector.shape_cast %35 : vector<2xf32> to vector<2x1xf32>
    %37 = tpu.reciprocal %36 {approx = true} : vector<2x1xf32> -> vector<2x1xf32>
    %38 = vector.broadcast %37 : vector<2x1xf32> to vector<2x4xf32>
    %39 = arith.mulf %38, %32 : vector<2x4xf32>
    %40 = vector.broadcast %37 : vector<2x1xf32> to vector<2x128xf32>
    %41 = arith.mulf %40, %34 : vector<2x128xf32>
    %42 = arith.addf %41, %17 : vector<2x128xf32>
    %43 = arith.addf %42, %8 : vector<2x128xf32>
    %44 = arith.negf %43 : vector<2x128xf32>
    %45 = math.exp %44 : vector<2x128xf32>
    %cst_26 = arith.constant 1.000000e+00 : f32
    %46 = vector.broadcast %cst_26 : f32 to vector<2x128xf32>
    %47 = arith.addf %46, %45 : vector<2x128xf32>
    %48 = arith.divf %46, %47 : vector<2x128xf32>
    %49 = math.tanh %43 : vector<2x128xf32>
    %50 = vector.extract_strided_slice %48 {offsets = [0, 0], sizes = [2, 32], strides = [1, 1]} : vector<2x128xf32> to vector<2x32xf32>
    %51 = vector.extract_strided_slice %48 {offsets = [0, 32], sizes = [2, 32], strides = [1, 1]} : vector<2x128xf32> to vector<2x32xf32>
    %52 = vector.extract_strided_slice %49 {offsets = [0, 64], sizes = [2, 32], strides = [1, 1]} : vector<2x128xf32> to vector<2x32xf32>
    %53 = vector.extract_strided_slice %48 {offsets = [0, 96], sizes = [2, 32], strides = [1, 1]} : vector<2x128xf32> to vector<2x32xf32>
    %54 = arith.mulf %51, %14 : vector<2x32xf32>
    %55 = arith.mulf %50, %52 : vector<2x32xf32>
    %56 = arith.addf %54, %55 : vector<2x32xf32>
    %57 = math.tanh %56 : vector<2x32xf32>
    %58 = arith.mulf %53, %57 : vector<2x32xf32>
    %59 = arith.truncf %58 : vector<2x32xf32> to vector<2x32xbf16>
    %60 = arith.truncf %56 : vector<2x32xf32> to vector<2x32xbf16>
    %cst_27 = arith.constant dense<0.000000e+00> : vector<2x128xf32>
    %61 = tpu.matmul %59, %12, %cst_27 {dimension_numbers = #tpu.dot_dimension_numbers<[1], [0], [0], [1], [0, 0, 1, 1], [], []>} : vector<2x32xbf16>, vector<32x128xbf16>, vector<2x128xf32> -> vector<2x128xf32>
    %cst_28 = arith.constant dense<0.000000e+00> : vector<2x8xf32>
    %62 = tpu.matmul %59, %9, %cst_28 {dimension_numbers = #tpu.dot_dimension_numbers<[1], [0], [0], [1], [0, 0, 1, 1], [], []>} : vector<2x32xbf16>, vector<32x8xbf16>, vector<2x8xf32> -> vector<2x8xf32>
    %cst_29 = arith.constant dense<0.000000e+00> : vector<2x8xf32>
    %63 = tpu.matmul %60, %10, %cst_29 {dimension_numbers = #tpu.dot_dimension_numbers<[1], [0], [0], [1], [0, 0, 1, 1], [], []>} : vector<2x32xbf16>, vector<32x8xbf16>, vector<2x8xf32> -> vector<2x8xf32>
    %64 = arith.addf %62, %63 : vector<2x8xf32>
    %65 = arith.addf %64, %5 : vector<2x8xf32>
    %66 = vector.shape_cast %65 : vector<2x8xf32> to vector<2x1x8xf32>
    %67 = vector.broadcast %66 : vector<2x1x8xf32> to vector<2x4x8xf32>
    %68 = arith.addf %67, %0 : vector<2x4x8xf32>
    %69 = math.tanh %68 : vector<2x4x8xf32>
    %70 = vector.broadcast %2 : vector<1x1x8xf32> to vector<2x4x8xf32>
    %71 = arith.mulf %69, %70 : vector<2x4x8xf32>
    %cst_30 = arith.constant dense<0.000000e+00> : vector<2x4xf32>
    %72 = vector.multi_reduction <add>, %71, %cst_30 [2] : vector<2x4x8xf32> to vector<2x4xf32>
    %73 = math.exp %72 : vector<2x4xf32>
    %c1 = arith.constant 1 : index
    %c0_31 = arith.constant 0 : index
    %c0_32 = arith.constant 0 : index
    %74 = vector.load %arg1[%c1, %c0_31, %c0_32] : memref<8x2x4xf32, #tpu.memory_space<vmem>>, vector<1x2x4xf32>
    %75 = vector.shape_cast %74 : vector<1x2x4xf32> to vector<2x4xf32>
    %76 = arith.mulf %73, %75 : vector<2x4xf32>
    %77 = arith.truncf %76 : vector<2x4xf32> to vector<2x4xbf16>
    %cst_33 = arith.constant dense<0.000000e+00> : vector<2x128xf32>
    %78 = tpu.matmul %77, %11, %cst_33 {dimension_numbers = #tpu.dot_dimension_numbers<[1], [0], [0], [1], [0, 0, 1, 1], [], []>} : vector<2x4xbf16>, vector<4x128xbf16>, vector<2x128xf32> -> vector<2x128xf32>
    %cst_34 = arith.constant dense<0.000000e+00> : vector<2xf32>
    %79 = vector.multi_reduction <add>, %73, %cst_34 [1] : vector<2x4xf32> to vector<2xf32>
    %80 = vector.shape_cast %79 : vector<2xf32> to vector<2x1xf32>
    %81 = tpu.reciprocal %80 {approx = true} : vector<2x1xf32> -> vector<2x1xf32>
    %82 = vector.broadcast %81 : vector<2x1xf32> to vector<2x4xf32>
    %83 = arith.mulf %82, %76 : vector<2x4xf32>
    %84 = vector.broadcast %81 : vector<2x1xf32> to vector<2x128xf32>
    %85 = arith.mulf %84, %78 : vector<2x128xf32>
    %86 = arith.addf %85, %61 : vector<2x128xf32>
    %87 = arith.addf %86, %8 : vector<2x128xf32>
    %88 = arith.negf %87 : vector<2x128xf32>
    %89 = math.exp %88 : vector<2x128xf32>
    %cst_35 = arith.constant 1.000000e+00 : f32
    %90 = vector.broadcast %cst_35 : f32 to vector<2x128xf32>
    %91 = arith.addf %90, %89 : vector<2x128xf32>
    %92 = arith.divf %90, %91 : vector<2x128xf32>
    %93 = math.tanh %87 : vector<2x128xf32>
    %94 = vector.extract_strided_slice %92 {offsets = [0, 0], sizes = [2, 32], strides = [1, 1]} : vector<2x128xf32> to vector<2x32xf32>
    %95 = vector.extract_strided_slice %92 {offsets = [0, 32], sizes = [2, 32], strides = [1, 1]} : vector<2x128xf32> to vector<2x32xf32>
    %96 = vector.extract_strided_slice %93 {offsets = [0, 64], sizes = [2, 32], strides = [1, 1]} : vector<2x128xf32> to vector<2x32xf32>
    %97 = vector.extract_strided_slice %92 {offsets = [0, 96], sizes = [2, 32], strides = [1, 1]} : vector<2x128xf32> to vector<2x32xf32>
    %98 = arith.mulf %95, %56 : vector<2x32xf32>
    %99 = arith.mulf %94, %96 : vector<2x32xf32>
    %100 = arith.addf %98, %99 : vector<2x32xf32>
    %101 = math.tanh %100 : vector<2x32xf32>
    %102 = arith.mulf %97, %101 : vector<2x32xf32>
    %103 = arith.truncf %102 : vector<2x32xf32> to vector<2x32xbf16>
    %104 = arith.truncf %100 : vector<2x32xf32> to vector<2x32xbf16>
    %cst_36 = arith.constant dense<0.000000e+00> : vector<2x128xf32>
    %105 = tpu.matmul %103, %12, %cst_36 {dimension_numbers = #tpu.dot_dimension_numbers<[1], [0], [0], [1], [0, 0, 1, 1], [], []>} : vector<2x32xbf16>, vector<32x128xbf16>, vector<2x128xf32> -> vector<2x128xf32>
    %cst_37 = arith.constant dense<0.000000e+00> : vector<2x8xf32>
    %106 = tpu.matmul %103, %9, %cst_37 {dimension_numbers = #tpu.dot_dimension_numbers<[1], [0], [0], [1], [0, 0, 1, 1], [], []>} : vector<2x32xbf16>, vector<32x8xbf16>, vector<2x8xf32> -> vector<2x8xf32>
    %cst_38 = arith.constant dense<0.000000e+00> : vector<2x8xf32>
    %107 = tpu.matmul %104, %10, %cst_38 {dimension_numbers = #tpu.dot_dimension_numbers<[1], [0], [0], [1], [0, 0, 1, 1], [], []>} : vector<2x32xbf16>, vector<32x8xbf16>, vector<2x8xf32> -> vector<2x8xf32>
    %108 = arith.addf %106, %107 : vector<2x8xf32>
    %109 = arith.addf %108, %5 : vector<2x8xf32>
    %110 = vector.shape_cast %109 : vector<2x8xf32> to vector<2x1x8xf32>
    %111 = vector.broadcast %110 : vector<2x1x8xf32> to vector<2x4x8xf32>
    %112 = arith.addf %111, %0 : vector<2x4x8xf32>
    %113 = math.tanh %112 : vector<2x4x8xf32>
    %114 = vector.broadcast %2 : vector<1x1x8xf32> to vector<2x4x8xf32>
    %115 = arith.mulf %113, %114 : vector<2x4x8xf32>
    %cst_39 = arith.constant dense<0.000000e+00> : vector<2x4xf32>
    %116 = vector.multi_reduction <add>, %115, %cst_39 [2] : vector<2x4x8xf32> to vector<2x4xf32>
    %117 = math.exp %116 : vector<2x4xf32>
    %c2 = arith.constant 2 : index
    %c0_40 = arith.constant 0 : index
    %c0_41 = arith.constant 0 : index
    %118 = vector.load %arg1[%c2, %c0_40, %c0_41] : memref<8x2x4xf32, #tpu.memory_space<vmem>>, vector<1x2x4xf32>
    %119 = vector.shape_cast %118 : vector<1x2x4xf32> to vector<2x4xf32>
    %120 = arith.mulf %117, %119 : vector<2x4xf32>
    %121 = arith.truncf %120 : vector<2x4xf32> to vector<2x4xbf16>
    %cst_42 = arith.constant dense<0.000000e+00> : vector<2x128xf32>
    %122 = tpu.matmul %121, %11, %cst_42 {dimension_numbers = #tpu.dot_dimension_numbers<[1], [0], [0], [1], [0, 0, 1, 1], [], []>} : vector<2x4xbf16>, vector<4x128xbf16>, vector<2x128xf32> -> vector<2x128xf32>
    %cst_43 = arith.constant dense<0.000000e+00> : vector<2xf32>
    %123 = vector.multi_reduction <add>, %117, %cst_43 [1] : vector<2x4xf32> to vector<2xf32>
    %124 = vector.shape_cast %123 : vector<2xf32> to vector<2x1xf32>
    %125 = tpu.reciprocal %124 {approx = true} : vector<2x1xf32> -> vector<2x1xf32>
    %126 = vector.broadcast %125 : vector<2x1xf32> to vector<2x4xf32>
    %127 = arith.mulf %126, %120 : vector<2x4xf32>
    %128 = vector.broadcast %125 : vector<2x1xf32> to vector<2x128xf32>
    %129 = arith.mulf %128, %122 : vector<2x128xf32>
    %130 = arith.addf %129, %105 : vector<2x128xf32>
    %131 = arith.addf %130, %8 : vector<2x128xf32>
    %132 = arith.negf %131 : vector<2x128xf32>
    %133 = math.exp %132 : vector<2x128xf32>
    %cst_44 = arith.constant 1.000000e+00 : f32
    %134 = vector.broadcast %cst_44 : f32 to vector<2x128xf32>
    %135 = arith.addf %134, %133 : vector<2x128xf32>
    %136 = arith.divf %134, %135 : vector<2x128xf32>
    %137 = math.tanh %131 : vector<2x128xf32>
    %138 = vector.extract_strided_slice %136 {offsets = [0, 0], sizes = [2, 32], strides = [1, 1]} : vector<2x128xf32> to vector<2x32xf32>
    %139 = vector.extract_strided_slice %136 {offsets = [0, 32], sizes = [2, 32], strides = [1, 1]} : vector<2x128xf32> to vector<2x32xf32>
    %140 = vector.extract_strided_slice %137 {offsets = [0, 64], sizes = [2, 32], strides = [1, 1]} : vector<2x128xf32> to vector<2x32xf32>
    %141 = vector.extract_strided_slice %136 {offsets = [0, 96], sizes = [2, 32], strides = [1, 1]} : vector<2x128xf32> to vector<2x32xf32>
    %142 = arith.mulf %139, %100 : vector<2x32xf32>
    %143 = arith.mulf %138, %140 : vector<2x32xf32>
    %144 = arith.addf %142, %143 : vector<2x32xf32>
    %145 = math.tanh %144 : vector<2x32xf32>
    %146 = arith.mulf %141, %145 : vector<2x32xf32>
    %147 = arith.truncf %146 : vector<2x32xf32> to vector<2x32xbf16>
    %148 = arith.truncf %144 : vector<2x32xf32> to vector<2x32xbf16>
    %cst_45 = arith.constant dense<0.000000e+00> : vector<2x128xf32>
    %149 = tpu.matmul %147, %12, %cst_45 {dimension_numbers = #tpu.dot_dimension_numbers<[1], [0], [0], [1], [0, 0, 1, 1], [], []>} : vector<2x32xbf16>, vector<32x128xbf16>, vector<2x128xf32> -> vector<2x128xf32>
    %cst_46 = arith.constant dense<0.000000e+00> : vector<2x8xf32>
    %150 = tpu.matmul %147, %9, %cst_46 {dimension_numbers = #tpu.dot_dimension_numbers<[1], [0], [0], [1], [0, 0, 1, 1], [], []>} : vector<2x32xbf16>, vector<32x8xbf16>, vector<2x8xf32> -> vector<2x8xf32>
    %cst_47 = arith.constant dense<0.000000e+00> : vector<2x8xf32>
    %151 = tpu.matmul %148, %10, %cst_47 {dimension_numbers = #tpu.dot_dimension_numbers<[1], [0], [0], [1], [0, 0, 1, 1], [], []>} : vector<2x32xbf16>, vector<32x8xbf16>, vector<2x8xf32> -> vector<2x8xf32>
    %152 = arith.addf %150, %151 : vector<2x8xf32>
    %153 = arith.addf %152, %5 : vector<2x8xf32>
    %154 = vector.shape_cast %153 : vector<2x8xf32> to vector<2x1x8xf32>
    %155 = vector.broadcast %154 : vector<2x1x8xf32> to vector<2x4x8xf32>
    %156 = arith.addf %155, %0 : vector<2x4x8xf32>
    %157 = math.tanh %156 : vector<2x4x8xf32>
    %158 = vector.broadcast %2 : vector<1x1x8xf32> to vector<2x4x8xf32>
    %159 = arith.mulf %157, %158 : vector<2x4x8xf32>
    %cst_48 = arith.constant dense<0.000000e+00> : vector<2x4xf32>
    %160 = vector.multi_reduction <add>, %159, %cst_48 [2] : vector<2x4x8xf32> to vector<2x4xf32>
    %161 = math.exp %160 : vector<2x4xf32>
    %c3 = arith.constant 3 : index
    %c0_49 = arith.constant 0 : index
    %c0_50 = arith.constant 0 : index
    %162 = vector.load %arg1[%c3, %c0_49, %c0_50] : memref<8x2x4xf32, #tpu.memory_space<vmem>>, vector<1x2x4xf32>
    %163 = vector.shape_cast %162 : vector<1x2x4xf32> to vector<2x4xf32>
    %164 = arith.mulf %161, %163 : vector<2x4xf32>
    %165 = arith.truncf %164 : vector<2x4xf32> to vector<2x4xbf16>
    %cst_51 = arith.constant dense<0.000000e+00> : vector<2x128xf32>
    %166 = tpu.matmul %165, %11, %cst_51 {dimension_numbers = #tpu.dot_dimension_numbers<[1], [0], [0], [1], [0, 0, 1, 1], [], []>} : vector<2x4xbf16>, vector<4x128xbf16>, vector<2x128xf32> -> vector<2x128xf32>
    %cst_52 = arith.constant dense<0.000000e+00> : vector<2xf32>
    %167 = vector.multi_reduction <add>, %161, %cst_52 [1] : vector<2x4xf32> to vector<2xf32>
    %168 = vector.shape_cast %167 : vector<2xf32> to vector<2x1xf32>
    %169 = tpu.reciprocal %168 {approx = true} : vector<2x1xf32> -> vector<2x1xf32>
    %170 = vector.broadcast %169 : vector<2x1xf32> to vector<2x4xf32>
    %171 = arith.mulf %170, %164 : vector<2x4xf32>
    %172 = vector.broadcast %169 : vector<2x1xf32> to vector<2x128xf32>
    %173 = arith.mulf %172, %166 : vector<2x128xf32>
    %174 = arith.addf %173, %149 : vector<2x128xf32>
    %175 = arith.addf %174, %8 : vector<2x128xf32>
    %176 = arith.negf %175 : vector<2x128xf32>
    %177 = math.exp %176 : vector<2x128xf32>
    %cst_53 = arith.constant 1.000000e+00 : f32
    %178 = vector.broadcast %cst_53 : f32 to vector<2x128xf32>
    %179 = arith.addf %178, %177 : vector<2x128xf32>
    %180 = arith.divf %178, %179 : vector<2x128xf32>
    %181 = math.tanh %175 : vector<2x128xf32>
    %182 = vector.extract_strided_slice %180 {offsets = [0, 0], sizes = [2, 32], strides = [1, 1]} : vector<2x128xf32> to vector<2x32xf32>
    %183 = vector.extract_strided_slice %180 {offsets = [0, 32], sizes = [2, 32], strides = [1, 1]} : vector<2x128xf32> to vector<2x32xf32>
    %184 = vector.extract_strided_slice %181 {offsets = [0, 64], sizes = [2, 32], strides = [1, 1]} : vector<2x128xf32> to vector<2x32xf32>
    %185 = vector.extract_strided_slice %180 {offsets = [0, 96], sizes = [2, 32], strides = [1, 1]} : vector<2x128xf32> to vector<2x32xf32>
    %186 = arith.mulf %183, %144 : vector<2x32xf32>
    %187 = arith.mulf %182, %184 : vector<2x32xf32>
    %188 = arith.addf %186, %187 : vector<2x32xf32>
    %189 = math.tanh %188 : vector<2x32xf32>
    %190 = arith.mulf %185, %189 : vector<2x32xf32>
    %191 = arith.truncf %190 : vector<2x32xf32> to vector<2x32xbf16>
    %192 = arith.truncf %188 : vector<2x32xf32> to vector<2x32xbf16>
    %cst_54 = arith.constant dense<0.000000e+00> : vector<2x128xf32>
    %193 = tpu.matmul %191, %12, %cst_54 {dimension_numbers = #tpu.dot_dimension_numbers<[1], [0], [0], [1], [0, 0, 1, 1], [], []>} : vector<2x32xbf16>, vector<32x128xbf16>, vector<2x128xf32> -> vector<2x128xf32>
    %cst_55 = arith.constant dense<0.000000e+00> : vector<2x8xf32>
    %194 = tpu.matmul %191, %9, %cst_55 {dimension_numbers = #tpu.dot_dimension_numbers<[1], [0], [0], [1], [0, 0, 1, 1], [], []>} : vector<2x32xbf16>, vector<32x8xbf16>, vector<2x8xf32> -> vector<2x8xf32>
    %cst_56 = arith.constant dense<0.000000e+00> : vector<2x8xf32>
    %195 = tpu.matmul %192, %10, %cst_56 {dimension_numbers = #tpu.dot_dimension_numbers<[1], [0], [0], [1], [0, 0, 1, 1], [], []>} : vector<2x32xbf16>, vector<32x8xbf16>, vector<2x8xf32> -> vector<2x8xf32>
    %196 = arith.addf %194, %195 : vector<2x8xf32>
    %197 = arith.addf %196, %5 : vector<2x8xf32>
    %198 = vector.shape_cast %197 : vector<2x8xf32> to vector<2x1x8xf32>
    %199 = vector.broadcast %198 : vector<2x1x8xf32> to vector<2x4x8xf32>
    %200 = arith.addf %199, %0 : vector<2x4x8xf32>
    %201 = math.tanh %200 : vector<2x4x8xf32>
    %202 = vector.broadcast %2 : vector<1x1x8xf32> to vector<2x4x8xf32>
    %203 = arith.mulf %201, %202 : vector<2x4x8xf32>
    %cst_57 = arith.constant dense<0.000000e+00> : vector<2x4xf32>
    %204 = vector.multi_reduction <add>, %203, %cst_57 [2] : vector<2x4x8xf32> to vector<2x4xf32>
    %205 = math.exp %204 : vector<2x4xf32>
    %c4 = arith.constant 4 : index
    %c0_58 = arith.constant 0 : index
    %c0_59 = arith.constant 0 : index
    %206 = vector.load %arg1[%c4, %c0_58, %c0_59] : memref<8x2x4xf32, #tpu.memory_space<vmem>>, vector<1x2x4xf32>
    %207 = vector.shape_cast %206 : vector<1x2x4xf32> to vector<2x4xf32>
    %208 = arith.mulf %205, %207 : vector<2x4xf32>
    %209 = arith.truncf %208 : vector<2x4xf32> to vector<2x4xbf16>
    %cst_60 = arith.constant dense<0.000000e+00> : vector<2x128xf32>
    %210 = tpu.matmul %209, %11, %cst_60 {dimension_numbers = #tpu.dot_dimension_numbers<[1], [0], [0], [1], [0, 0, 1, 1], [], []>} : vector<2x4xbf16>, vector<4x128xbf16>, vector<2x128xf32> -> vector<2x128xf32>
    %cst_61 = arith.constant dense<0.000000e+00> : vector<2xf32>
    %211 = vector.multi_reduction <add>, %205, %cst_61 [1] : vector<2x4xf32> to vector<2xf32>
    %212 = vector.shape_cast %211 : vector<2xf32> to vector<2x1xf32>
    %213 = tpu.reciprocal %212 {approx = true} : vector<2x1xf32> -> vector<2x1xf32>
    %214 = vector.broadcast %213 : vector<2x1xf32> to vector<2x4xf32>
    %215 = arith.mulf %214, %208 : vector<2x4xf32>
    %216 = vector.broadcast %213 : vector<2x1xf32> to vector<2x128xf32>
    %217 = arith.mulf %216, %210 : vector<2x128xf32>
    %218 = arith.addf %217, %193 : vector<2x128xf32>
    %219 = arith.addf %218, %8 : vector<2x128xf32>
    %220 = arith.negf %219 : vector<2x128xf32>
    %221 = math.exp %220 : vector<2x128xf32>
    %cst_62 = arith.constant 1.000000e+00 : f32
    %222 = vector.broadcast %cst_62 : f32 to vector<2x128xf32>
    %223 = arith.addf %222, %221 : vector<2x128xf32>
    %224 = arith.divf %222, %223 : vector<2x128xf32>
    %225 = math.tanh %219 : vector<2x128xf32>
    %226 = vector.extract_strided_slice %224 {offsets = [0, 0], sizes = [2, 32], strides = [1, 1]} : vector<2x128xf32> to vector<2x32xf32>
    %227 = vector.extract_strided_slice %224 {offsets = [0, 32], sizes = [2, 32], strides = [1, 1]} : vector<2x128xf32> to vector<2x32xf32>
    %228 = vector.extract_strided_slice %225 {offsets = [0, 64], sizes = [2, 32], strides = [1, 1]} : vector<2x128xf32> to vector<2x32xf32>
    %229 = vector.extract_strided_slice %224 {offsets = [0, 96], sizes = [2, 32], strides = [1, 1]} : vector<2x128xf32> to vector<2x32xf32>
    %230 = arith.mulf %227, %188 : vector<2x32xf32>
    %231 = arith.mulf %226, %228 : vector<2x32xf32>
    %232 = arith.addf %230, %231 : vector<2x32xf32>
    %233 = math.tanh %232 : vector<2x32xf32>
    %234 = arith.mulf %229, %233 : vector<2x32xf32>
    %235 = arith.truncf %234 : vector<2x32xf32> to vector<2x32xbf16>
    %236 = arith.truncf %232 : vector<2x32xf32> to vector<2x32xbf16>
    %cst_63 = arith.constant dense<0.000000e+00> : vector<2x128xf32>
    %237 = tpu.matmul %235, %12, %cst_63 {dimension_numbers = #tpu.dot_dimension_numbers<[1], [0], [0], [1], [0, 0, 1, 1], [], []>} : vector<2x32xbf16>, vector<32x128xbf16>, vector<2x128xf32> -> vector<2x128xf32>
    %cst_64 = arith.constant dense<0.000000e+00> : vector<2x8xf32>
    %238 = tpu.matmul %235, %9, %cst_64 {dimension_numbers = #tpu.dot_dimension_numbers<[1], [0], [0], [1], [0, 0, 1, 1], [], []>} : vector<2x32xbf16>, vector<32x8xbf16>, vector<2x8xf32> -> vector<2x8xf32>
    %cst_65 = arith.constant dense<0.000000e+00> : vector<2x8xf32>
    %239 = tpu.matmul %236, %10, %cst_65 {dimension_numbers = #tpu.dot_dimension_numbers<[1], [0], [0], [1], [0, 0, 1, 1], [], []>} : vector<2x32xbf16>, vector<32x8xbf16>, vector<2x8xf32> -> vector<2x8xf32>
    %240 = arith.addf %238, %239 : vector<2x8xf32>
    %241 = arith.addf %240, %5 : vector<2x8xf32>
    %242 = vector.shape_cast %241 : vector<2x8xf32> to vector<2x1x8xf32>
    %243 = vector.broadcast %242 : vector<2x1x8xf32> to vector<2x4x8xf32>
    %244 = arith.addf %243, %0 : vector<2x4x8xf32>
    %245 = math.tanh %244 : vector<2x4x8xf32>
    %246 = vector.broadcast %2 : vector<1x1x8xf32> to vector<2x4x8xf32>
    %247 = arith.mulf %245, %246 : vector<2x4x8xf32>
    %cst_66 = arith.constant dense<0.000000e+00> : vector<2x4xf32>
    %248 = vector.multi_reduction <add>, %247, %cst_66 [2] : vector<2x4x8xf32> to vector<2x4xf32>
    %249 = math.exp %248 : vector<2x4xf32>
    %c5 = arith.constant 5 : index
    %c0_67 = arith.constant 0 : index
    %c0_68 = arith.constant 0 : index
    %250 = vector.load %arg1[%c5, %c0_67, %c0_68] : memref<8x2x4xf32, #tpu.memory_space<vmem>>, vector<1x2x4xf32>
    %251 = vector.shape_cast %250 : vector<1x2x4xf32> to vector<2x4xf32>
    %252 = arith.mulf %249, %251 : vector<2x4xf32>
    %253 = arith.truncf %252 : vector<2x4xf32> to vector<2x4xbf16>
    %cst_69 = arith.constant dense<0.000000e+00> : vector<2x128xf32>
    %254 = tpu.matmul %253, %11, %cst_69 {dimension_numbers = #tpu.dot_dimension_numbers<[1], [0], [0], [1], [0, 0, 1, 1], [], []>} : vector<2x4xbf16>, vector<4x128xbf16>, vector<2x128xf32> -> vector<2x128xf32>
    %cst_70 = arith.constant dense<0.000000e+00> : vector<2xf32>
    %255 = vector.multi_reduction <add>, %249, %cst_70 [1] : vector<2x4xf32> to vector<2xf32>
    %256 = vector.shape_cast %255 : vector<2xf32> to vector<2x1xf32>
    %257 = tpu.reciprocal %256 {approx = true} : vector<2x1xf32> -> vector<2x1xf32>
    %258 = vector.broadcast %257 : vector<2x1xf32> to vector<2x4xf32>
    %259 = arith.mulf %258, %252 : vector<2x4xf32>
    %260 = vector.broadcast %257 : vector<2x1xf32> to vector<2x128xf32>
    %261 = arith.mulf %260, %254 : vector<2x128xf32>
    %262 = arith.addf %261, %237 : vector<2x128xf32>
    %263 = arith.addf %262, %8 : vector<2x128xf32>
    %264 = arith.negf %263 : vector<2x128xf32>
    %265 = math.exp %264 : vector<2x128xf32>
    %cst_71 = arith.constant 1.000000e+00 : f32
    %266 = vector.broadcast %cst_71 : f32 to vector<2x128xf32>
    %267 = arith.addf %266, %265 : vector<2x128xf32>
    %268 = arith.divf %266, %267 : vector<2x128xf32>
    %269 = math.tanh %263 : vector<2x128xf32>
    %270 = vector.extract_strided_slice %268 {offsets = [0, 0], sizes = [2, 32], strides = [1, 1]} : vector<2x128xf32> to vector<2x32xf32>
    %271 = vector.extract_strided_slice %268 {offsets = [0, 32], sizes = [2, 32], strides = [1, 1]} : vector<2x128xf32> to vector<2x32xf32>
    %272 = vector.extract_strided_slice %269 {offsets = [0, 64], sizes = [2, 32], strides = [1, 1]} : vector<2x128xf32> to vector<2x32xf32>
    %273 = vector.extract_strided_slice %268 {offsets = [0, 96], sizes = [2, 32], strides = [1, 1]} : vector<2x128xf32> to vector<2x32xf32>
    %274 = arith.mulf %271, %232 : vector<2x32xf32>
    %275 = arith.mulf %270, %272 : vector<2x32xf32>
    %276 = arith.addf %274, %275 : vector<2x32xf32>
    %277 = math.tanh %276 : vector<2x32xf32>
    %278 = arith.mulf %273, %277 : vector<2x32xf32>
    %279 = arith.truncf %278 : vector<2x32xf32> to vector<2x32xbf16>
    %280 = arith.truncf %276 : vector<2x32xf32> to vector<2x32xbf16>
    %cst_72 = arith.constant dense<0.000000e+00> : vector<2x128xf32>
    %281 = tpu.matmul %279, %12, %cst_72 {dimension_numbers = #tpu.dot_dimension_numbers<[1], [0], [0], [1], [0, 0, 1, 1], [], []>} : vector<2x32xbf16>, vector<32x128xbf16>, vector<2x128xf32> -> vector<2x128xf32>
    %cst_73 = arith.constant dense<0.000000e+00> : vector<2x8xf32>
    %282 = tpu.matmul %279, %9, %cst_73 {dimension_numbers = #tpu.dot_dimension_numbers<[1], [0], [0], [1], [0, 0, 1, 1], [], []>} : vector<2x32xbf16>, vector<32x8xbf16>, vector<2x8xf32> -> vector<2x8xf32>
    %cst_74 = arith.constant dense<0.000000e+00> : vector<2x8xf32>
    %283 = tpu.matmul %280, %10, %cst_74 {dimension_numbers = #tpu.dot_dimension_numbers<[1], [0], [0], [1], [0, 0, 1, 1], [], []>} : vector<2x32xbf16>, vector<32x8xbf16>, vector<2x8xf32> -> vector<2x8xf32>
    %284 = arith.addf %282, %283 : vector<2x8xf32>
    %285 = arith.addf %284, %5 : vector<2x8xf32>
    %286 = vector.shape_cast %285 : vector<2x8xf32> to vector<2x1x8xf32>
    %287 = vector.broadcast %286 : vector<2x1x8xf32> to vector<2x4x8xf32>
    %288 = arith.addf %287, %0 : vector<2x4x8xf32>
    %289 = math.tanh %288 : vector<2x4x8xf32>
    %290 = vector.broadcast %2 : vector<1x1x8xf32> to vector<2x4x8xf32>
    %291 = arith.mulf %289, %290 : vector<2x4x8xf32>
    %cst_75 = arith.constant dense<0.000000e+00> : vector<2x4xf32>
    %292 = vector.multi_reduction <add>, %291, %cst_75 [2] : vector<2x4x8xf32> to vector<2x4xf32>
    %293 = math.exp %292 : vector<2x4xf32>
    %c6 = arith.constant 6 : index
    %c0_76 = arith.constant 0 : index
    %c0_77 = arith.constant 0 : index
    %294 = vector.load %arg1[%c6, %c0_76, %c0_77] : memref<8x2x4xf32, #tpu.memory_space<vmem>>, vector<1x2x4xf32>
    %295 = vector.shape_cast %294 : vector<1x2x4xf32> to vector<2x4xf32>
    %296 = arith.mulf %293, %295 : vector<2x4xf32>
    %297 = arith.truncf %296 : vector<2x4xf32> to vector<2x4xbf16>
    %cst_78 = arith.constant dense<0.000000e+00> : vector<2x128xf32>
    %298 = tpu.matmul %297, %11, %cst_78 {dimension_numbers = #tpu.dot_dimension_numbers<[1], [0], [0], [1], [0, 0, 1, 1], [], []>} : vector<2x4xbf16>, vector<4x128xbf16>, vector<2x128xf32> -> vector<2x128xf32>
    %cst_79 = arith.constant dense<0.000000e+00> : vector<2xf32>
    %299 = vector.multi_reduction <add>, %293, %cst_79 [1] : vector<2x4xf32> to vector<2xf32>
    %300 = vector.shape_cast %299 : vector<2xf32> to vector<2x1xf32>
    %301 = tpu.reciprocal %300 {approx = true} : vector<2x1xf32> -> vector<2x1xf32>
    %302 = vector.broadcast %301 : vector<2x1xf32> to vector<2x4xf32>
    %303 = arith.mulf %302, %296 : vector<2x4xf32>
    %304 = vector.broadcast %301 : vector<2x1xf32> to vector<2x128xf32>
    %305 = arith.mulf %304, %298 : vector<2x128xf32>
    %306 = arith.addf %305, %281 : vector<2x128xf32>
    %307 = arith.addf %306, %8 : vector<2x128xf32>
    %308 = arith.negf %307 : vector<2x128xf32>
    %309 = math.exp %308 : vector<2x128xf32>
    %cst_80 = arith.constant 1.000000e+00 : f32
    %310 = vector.broadcast %cst_80 : f32 to vector<2x128xf32>
    %311 = arith.addf %310, %309 : vector<2x128xf32>
    %312 = arith.divf %310, %311 : vector<2x128xf32>
    %313 = math.tanh %307 : vector<2x128xf32>
    %314 = vector.extract_strided_slice %312 {offsets = [0, 0], sizes = [2, 32], strides = [1, 1]} : vector<2x128xf32> to vector<2x32xf32>
    %315 = vector.extract_strided_slice %312 {offsets = [0, 32], sizes = [2, 32], strides = [1, 1]} : vector<2x128xf32> to vector<2x32xf32>
    %316 = vector.extract_strided_slice %313 {offsets = [0, 64], sizes = [2, 32], strides = [1, 1]} : vector<2x128xf32> to vector<2x32xf32>
    %317 = vector.extract_strided_slice %312 {offsets = [0, 96], sizes = [2, 32], strides = [1, 1]} : vector<2x128xf32> to vector<2x32xf32>
    %318 = arith.mulf %315, %276 : vector<2x32xf32>
    %319 = arith.mulf %314, %316 : vector<2x32xf32>
    %320 = arith.addf %318, %319 : vector<2x32xf32>
    %321 = math.tanh %320 : vector<2x32xf32>
    %322 = arith.mulf %317, %321 : vector<2x32xf32>
    %323 = arith.truncf %322 : vector<2x32xf32> to vector<2x32xbf16>
    %324 = arith.truncf %320 : vector<2x32xf32> to vector<2x32xbf16>
    %cst_81 = arith.constant dense<0.000000e+00> : vector<2x128xf32>
    %325 = tpu.matmul %323, %12, %cst_81 {dimension_numbers = #tpu.dot_dimension_numbers<[1], [0], [0], [1], [0, 0, 1, 1], [], []>} : vector<2x32xbf16>, vector<32x128xbf16>, vector<2x128xf32> -> vector<2x128xf32>
    %cst_82 = arith.constant dense<0.000000e+00> : vector<2x8xf32>
    %326 = tpu.matmul %323, %9, %cst_82 {dimension_numbers = #tpu.dot_dimension_numbers<[1], [0], [0], [1], [0, 0, 1, 1], [], []>} : vector<2x32xbf16>, vector<32x8xbf16>, vector<2x8xf32> -> vector<2x8xf32>
    %cst_83 = arith.constant dense<0.000000e+00> : vector<2x8xf32>
    %327 = tpu.matmul %324, %10, %cst_83 {dimension_numbers = #tpu.dot_dimension_numbers<[1], [0], [0], [1], [0, 0, 1, 1], [], []>} : vector<2x32xbf16>, vector<32x8xbf16>, vector<2x8xf32> -> vector<2x8xf32>
    %328 = arith.addf %326, %327 : vector<2x8xf32>
    %329 = arith.addf %328, %5 : vector<2x8xf32>
    %330 = vector.shape_cast %329 : vector<2x8xf32> to vector<2x1x8xf32>
    %331 = vector.broadcast %330 : vector<2x1x8xf32> to vector<2x4x8xf32>
    %332 = arith.addf %331, %0 : vector<2x4x8xf32>
    %333 = math.tanh %332 : vector<2x4x8xf32>
    %334 = vector.broadcast %2 : vector<1x1x8xf32> to vector<2x4x8xf32>
    %335 = arith.mulf %333, %334 : vector<2x4x8xf32>
    %cst_84 = arith.constant dense<0.000000e+00> : vector<2x4xf32>
    %336 = vector.multi_reduction <add>, %335, %cst_84 [2] : vector<2x4x8xf32> to vector<2x4xf32>
    %337 = math.exp %336 : vector<2x4xf32>
    %c7 = arith.constant 7 : index
    %c0_85 = arith.constant 0 : index
    %c0_86 = arith.constant 0 : index
    %338 = vector.load %arg1[%c7, %c0_85, %c0_86] : memref<8x2x4xf32, #tpu.memory_space<vmem>>, vector<1x2x4xf32>
    %339 = vector.shape_cast %338 : vector<1x2x4xf32> to vector<2x4xf32>
    %340 = arith.mulf %337, %339 : vector<2x4xf32>
    %341 = arith.truncf %340 : vector<2x4xf32> to vector<2x4xbf16>
    %cst_87 = arith.constant dense<0.000000e+00> : vector<2x128xf32>
    %342 = tpu.matmul %341, %11, %cst_87 {dimension_numbers = #tpu.dot_dimension_numbers<[1], [0], [0], [1], [0, 0, 1, 1], [], []>} : vector<2x4xbf16>, vector<4x128xbf16>, vector<2x128xf32> -> vector<2x128xf32>
    %cst_88 = arith.constant dense<0.000000e+00> : vector<2xf32>
    %343 = vector.multi_reduction <add>, %337, %cst_88 [1] : vector<2x4xf32> to vector<2xf32>
    %344 = vector.shape_cast %343 : vector<2xf32> to vector<2x1xf32>
    %345 = tpu.reciprocal %344 {approx = true} : vector<2x1xf32> -> vector<2x1xf32>
    %346 = vector.broadcast %345 : vector<2x1xf32> to vector<2x4xf32>
    %347 = arith.mulf %346, %340 : vector<2x4xf32>
    %348 = vector.broadcast %345 : vector<2x1xf32> to vector<2x128xf32>
    %349 = arith.mulf %348, %342 : vector<2x128xf32>
    %350 = arith.addf %349, %325 : vector<2x128xf32>
    %351 = arith.addf %350, %8 : vector<2x128xf32>
    %352 = arith.negf %351 : vector<2x128xf32>
    %353 = math.exp %352 : vector<2x128xf32>
    %cst_89 = arith.constant 1.000000e+00 : f32
    %354 = vector.broadcast %cst_89 : f32 to vector<2x128xf32>
    %355 = arith.addf %354, %353 : vector<2x128xf32>
    %356 = arith.divf %354, %355 : vector<2x128xf32>
    %357 = math.tanh %351 : vector<2x128xf32>
    %358 = vector.extract_strided_slice %356 {offsets = [0, 0], sizes = [2, 32], strides = [1, 1]} : vector<2x128xf32> to vector<2x32xf32>
    %359 = vector.extract_strided_slice %356 {offsets = [0, 32], sizes = [2, 32], strides = [1, 1]} : vector<2x128xf32> to vector<2x32xf32>
    %360 = vector.extract_strided_slice %357 {offsets = [0, 64], sizes = [2, 32], strides = [1, 1]} : vector<2x128xf32> to vector<2x32xf32>
    %361 = vector.extract_strided_slice %356 {offsets = [0, 96], sizes = [2, 32], strides = [1, 1]} : vector<2x128xf32> to vector<2x32xf32>
    %362 = arith.mulf %359, %320 : vector<2x32xf32>
    %363 = arith.mulf %358, %360 : vector<2x32xf32>
    %364 = arith.addf %362, %363 : vector<2x32xf32>
    %365 = math.tanh %364 : vector<2x32xf32>
    %366 = arith.mulf %361, %365 : vector<2x32xf32>
    %367 = tpu.concatenate %39, %83, %127, %171, %215, %259, %303, %347 in 1 : vector<2x4xf32>, vector<2x4xf32>, vector<2x4xf32>, vector<2x4xf32>, vector<2x4xf32>, vector<2x4xf32>, vector<2x4xf32>, vector<2x4xf32> -> vector<2x32xf32>
    %c0_90 = arith.constant 0 : index
    %c0_91 = arith.constant 0 : index
    %368 = vector.load %arg9[%c0_90, %c0_91] : memref<2x32xf32, #tpu.memory_space<vmem>>, vector<2x32xf32>
    tpu.vector_store %arg9[%c0_90, %c0_91], %367 {strides = array<i32>} : memref<2x32xf32, #tpu.memory_space<vmem>>, vector<2x32xf32>,
    %369 = tpu.concatenate %58, %102, %146, %190, %234, %278, %322, %366 in 1 : vector<2x32xf32>, vector<2x32xf32>, vector<2x32xf32>, vector<2x32xf32>, vector<2x32xf32>, vector<2x32xf32>, vector<2x32xf32>, vector<2x32xf32> -> vector<2x256xf32>
    %c0_92 = arith.constant 0 : index
    %c0_93 = arith.constant 0 : index
    %370 = vector.load %arg10[%c0_92, %c0_93] : memref<2x256xf32, #tpu.memory_space<vmem>>, vector<2x256xf32>
    tpu.vector_store %arg10[%c0_92, %c0_93], %369 {strides = array<i32>} : memref<2x256xf32, #tpu.memory_space<vmem>>, vector<2x256xf32>,
    return
  }
}

</mosaic_0001>

<bundles_post_ra>
// kernel: tpu_custom_call.1
= control target key start
LH: loop header
LB: loop body
LE: loop exit
PB: predicated region body
PF: predicated region fallthrough
CT: control target
= control target key end

     0   :  { %16 = vsyncpa [#allocation3], 0  ;;  %v2062_v3 = vmov 0   ;;  %s2769_s0 = inlined_call_operand.vmem [shape: f32[2,4,8], index: 0, kind: input, shape index: {}]   ;;  %s2770_s1 = inlined_call_operand.vmem [shape: f32[8,2,4], index: 1, kind: input, shape index: {}]   ;;  %s2771_s2 = inlined_call_operand.vmem [shape: bf16[32,8], index: 2, kind: input, shape index: {}]   ;;  %s2772_s3 = inlined_call_operand.vmem [shape: bf16[32,8], index: 3, kind: input, shape index: {}]   ;;  %s2773_s4 = inlined_call_operand.vmem [shape: f32[1,8], index: 4, kind: input, shape index: {}]   ;;  %s2774_s5 = inlined_call_operand.vmem [shape: f32[1,8], index: 5, kind: input, shape index: {}]   ;;  %s2775_s6 = inlined_call_operand.vmem [shape: bf16[4,128], index: 6, kind: input, shape index: {}]   ;;  %s2776_s7 = inlined_call_operand.vmem [shape: bf16[32,128], index: 7, kind: input, shape index: {}]   ;;  %s2777_s8 = inlined_call_operand.vmem [shape: f32[1,128], index: 8, kind: input, shape index: {}]   ;;  %s2778_s9 = inlined_call_operand.hbm [shape: f32[2,32], index: 9, kind: output, shape index: {0}]   ;;  %s2779_s10 = inlined_call_operand.hbm [shape: f32[2,256], index: 10, kind: output, shape index: {1}]  }
   0x1   :  { %v2133_v0 = vld [vmem:[%s2772_s3 + $0x8] sm:$0xff]  ;;  %v2143_v2 = vld [vmem:[%s2772_s3] sm:$0xff]  ;;  %1836 = vset.pattern.permute.xlu2 %v2062_v3 }
   0x2   :  { %v2138_v1 = vld [vmem:[%s2771_s2 + $0x8] sm:$0xff]  ;;  %108 = vmatpush.bf16.msra.mxu1 %v2133_v0  ;;  %v2151_v4 = vld [vmem:[%s2771_s2] sm:$0xff] }
   0x3   :  { %133 = vmatpush.bf16.msra.mxu2 %v2138_v1 }
   0x4   :  { %17 = vsyncpa [#allocation5], 0  ;;  %v170_v5 = vlaneseq  ;;  %v167_v7 = vld [vmem:[%s2770_s1] sm:$0x3]  ;;  %v2182_v19 = vld [vmem:[%s2769_s0 + $0x4] sm:$0xf] }
   0x5   :  { %v169_v8 = vperm.slane %v167_v7, 0  ;;  %v176_v9 = vperm.slane %v167_v7, 1  ;;  %v2171_v11 = vld [vmem:[%s2773_s4] ss:$0 sm:$0xff]  ;;  %vm156_vm0 = vcmask 60416   ;;  %vm203_vm1 = vcmask 1041409  }
   0x6   :  { %109 = vmatpush.bf16.msra.mxu1 %v2143_v2  ;;  %v2161_v6 = vshrl.u32 %v170_v5, 7  ;;  %v2177_v16 = vld [vmem:[%s2769_s0] sm:$0xf]  ;;  %v2199_v39 = vand.u32 127, %v170_v5  ;;  %vm233_vm2 = vcmask 25600   ;;  %v2212_v50 = vld [vmem:[%s2776_s7 + $0x8] sm:$0xff] }
   0x7   :  { %134 = vmatpush.bf16.msra.mxu2 %v2151_v4  ;;  %v2189_v24 = vld [vmem:[%s2774_s5] ss:$0 sm:$0xff]  ;;  %83 = vmatpush.bf16.msra.mxu0 %v2212_v50  ;;  %vm210_vm3 = vcmask 1041408   ;;  %vm206_vm4 = vcmask 31744   ;;  %s2063_s18 = smov 64   ;;  %s2064_s19 = smov 32  }
   0x8   :  { %1835 = vset.pattern.permute.xlu1 %v2161_v6  ;;  %1837 = vset.pattern.permute.xlu0 %v2161_v6  ;;  %v2218_v51 = vld [vmem:[%s2776_s7] sm:$0xff]  ;;  %s2065_s20 = smov 96   ;;  %vm73_vm9 = vcmask 261120   ;;  %s2067_s12 = smov 12  }
   0x9   :  { %110 = vmatmul.bf16.vlgmr.msra.gmra.mxu1 %v2062_v3  ;;  %v56_v52 = vld [vmem:[%s2775_s6] sm:$0x3]  ;;  %s2068_s13 = smov 16   ;;  %s2069_s14 = smov 8  }
   0xa   :  { %337 = vmatpush.bf16.msrb.mxu1 %v2138_v1  ;;  %135 = vmatmul.bf16.vlgmr.msra.gmra.mxu2 %v2062_v3  ;;  %v2224_v53 = vsel %vm210_vm3, %v56_v52, 0  ;;  %v2248_v7 = vld [vmem:[%s2777_s8] ss:$0 sm:$0xff]  ;;  %s2070_s15 = smov 20   ;;  %s2071_s16 = smov 24  }
   0xb   :  { %84 = vmatpush.bf16.msra.mxu0 %v2218_v51  ;;  %221 = vmatpush.bf16.msra.mxu3 %v2224_v53  ;;  %s1723_s6 = sshll.u32 %s2778_s9, 4  ;;  %s2074_s9 = smov [#allocation4]   ;;  %s1724_s6 = int_to_ptr.hbm [resolvable:$true] %s1723_s6 }
   0xc   :  { %414 = vmatpush.bf16.msrb.mxu2 %v2224_v53  ;;  %s1732_s17 = sshll.u32 %s2074_s9, 4  ;;  %s1734_s23 = sshll.u32 %s2779_s10, 4  ;;  %s1733_s17 = int_to_ptr.vmem [resolvable:$true] %s1732_s17  ;;  %s1735_s23 = int_to_ptr.hbm [resolvable:$true] %s1734_s23 }
   0xe   :  { %338 = vmatpush.bf16.msrb.mxu1 %v2151_v4  ;;  %85 = vmatmul.bf16.vlgmr.msra.gmra.mxu0 %v2062_v3 }
   0xf   :  { %324 = vmatpush.bf16.msrb.mxu0 %v2133_v0  ;;  %305 = vmatpush.bf16.msrb.mxu3 %v2212_v50 }
  0x10   :  { %174 = vperm.xlu1 %1835, %v169_v8   ;;  %606 = vmatpush.bf16.msra.mxu2 %v2224_v53 }
  0x12   :  { %529 = vmatpush.bf16.msra.mxu1 %v2138_v1 }
  0x13   :  { %325 = vmatpush.bf16.msrb.mxu0 %v2143_v2  ;;  %306 = vmatpush.bf16.msrb.mxu3 %v2218_v51 }
  0x16   :  { %530 = vmatpush.bf16.msra.mxu1 %v2151_v4 }
  0x17   :  { %516 = vmatpush.bf16.msra.mxu0 %v2133_v0 }
  0x18   :  { %181 = vperm.xlu1 %1835, %v176_v9  }
  0x1b   :  { %517 = vmatpush.bf16.msra.mxu0 %v2143_v2 }
  0x82   :  { %v175_v33 = vpop.permute.xlu1 %174 }
  0x86   :  { %v111_v10 = vpop.f32.mrf.mxu1 }
  0x8a   :  { %v182_v42 = vpop.permute.xlu1 %181 }
  0x8b   :  { %v86_v60 = vpop.f32.mrf.mxu0 }
  0x8d   :  { %v136_v12 = vpop.f32.mrf.mxu2 }
  0x8e   :  { %v137_v13 = vadd.f32 %v136_v12, %v111_v10  ;;  %v113_v14 = vpop.f32.mrf.mxu1 }
  0x90   :  { %v140_v15 = vadd.f32 %v2171_v11, %v137_v13 }
  0x92   :  { %v142_v17 = vrot.slane %v140_v15, 1  ;;  %v143_v18 = vperm.slane %v140_v15, 0 }
  0x93   :  { %v88_v61 = vpop.f32.mrf.mxu0 }
  0x94   :  { %v144_v20 = vperm.slane %v142_v17, 0  ;;  %v147_v21 = vadd.f32 %v143_v18, %v2177_v16 }
  0x95   :  { %v138_v22 = vpop.f32.mrf.mxu2 }
  0x96   :  { %v148_v23 = vadd.f32 %v144_v20, %v2182_v19  ;;  %1855 = vtanh.f32 %v147_v21 }
  0x98   :  { %1857 = vtanh.f32 %v148_v23 }
  0x9c   :  { %v1856_v25 = vpop.eup %1855 }
  0x9d   :  { %v154_v26 = vmul.f32 %v1856_v25, %v2189_v24 }
  0x9e   :  { %v1858_v28 = vpop.eup %1857 }
  0x9f   :  { %v157_v27 = vsel %vm156_vm0, %v154_v26, 0.0  ;;  %v155_v29 = vmul.f32 %v1858_v28, %v2189_v24 }
  0xa0   :  { %158 = vadd.xlane.f32.xlu0 %v157_v27 }
  0xa1   :  { %v160_v30 = vsel %vm156_vm0, %v155_v29, 0.0 }
  0xa8   :  { %161 = vadd.xlane.f32.xlu0 %v160_v30 }
 0x113   :  { %v159_v31 = vpop.xlane.xlu0 %158 }
 0x114   :  { %v163_v32 = vmul.f32 1.442695, %v159_v31 }
 0x116   :  { %1859 = vpow2.f32 %v163_v32 }
 0x11b   :  { %v162_v34 = vpop.xlane.xlu0 %161 }
 0x11c   :  { %v1860_v35 = vpop.eup %1859  ;;  %v165_v36 = vmul.f32 1.442695, %v162_v34 }
 0x11d   :  { %v2195_v37 = vmul.f32 %v1860_v35, %v175_v33  ;;  %v229_v44 = vperm.slane %v1860_v35, %v2199_v39 }
 0x11e   :  { %1861 = vpow2.f32 %v165_v36 }
 0x11f   :  { %v187_v38 = vpack.c.bf16 %v2195_v37, %v2195_v37 }
 0x121   :  { %v191_v40 = vunpack.c.l.b16 %v187_v38 }
 0x123   :  { %194 = vperm.xlu2 %1836, %v191_v40  }
 0x124   :  { %v1862_v41 = vpop.eup %1861 }
 0x125   :  { %v2201_v43 = vmul.f32 %v1862_v41, %v182_v42  ;;  %v230_v45 = vperm.slane %v1862_v41, %v2199_v39 }
 0x127   :  { %v188_v46 = vpack.c.bf16 %v2201_v43, %v2201_v43  ;;  %v231_v47 = vsel %vm203_vm1, %v230_v45, %v229_v44 }
 0x128   :  { %v234_v48 = vsel %vm233_vm2, %v231_v47, 0.0  ;;  %v1777_v47 = vld [vmem:[%s2770_s1 + $0x2] sm:$0x3] }
 0x129   :  { %v192_v49 = vunpack.c.l.b16 %v188_v46  ;;  %235 = vadd.xlane.f32.xlu0 %v234_v48  ;;  %v370_v48 = vperm.slane %v1777_v47, 0 }
 0x12b   :  { %197 = vperm.xlu2 %1836, %v192_v49   ;;  %v377_v49 = vperm.slane %v1777_v47, 1 }
 0x17d   :  { %v195_v54 = vpop.permute.xlu2 %194 }
 0x17e   :  { %v201_v56 = vperm.slane %v195_v54, %v2199_v39 }
 0x185   :  { %v198_v55 = vpop.permute.xlu2 %197 }
 0x186   :  { %v202_v57 = vperm.slane %v198_v55, %v2199_v39 }
 0x188   :  { %v204_v58 = vsel %vm203_vm1, %v202_v57, %v201_v56 }
 0x189   :  { %v205_v59 = vpack.c.b16 %v204_v58, %v204_v58 }
 0x18b   :  { %1772 = vmatmul.msk.bf16.vlgmr.msra.gmra.mxu3 %vm206_vm4, %v205_v59 }
 0x18c   :  { %497 = vmatpush.bf16.msra.mxu3 %v2212_v50 }
 0x190   :  { %498 = vmatpush.bf16.msra.mxu3 %v2218_v51 }
 0x19c   :  { %v236_v62 = vpop.xlane.xlu0 %235 }
 0x19d   :  { %1863 = vrcp.f32 %v236_v62 }
 0x1a3   :  { %v2243_v63 = vpop.eup %1863 }
 0x20e   :  { %v223_v5 = vpop.f32.mrf.mxu3 }
 0x20f   :  { %v251_v8 = vmul.f32 %v2243_v63, %v223_v5 }
 0x211   :  { %v252_v9 = vadd.f32 %v251_v8, %v86_v60 }
 0x213   :  { %v253_v10 = vadd.f32 %v2248_v7, %v252_v9 }
 0x215   :  { %1865 = vtanh.f32 %v253_v10  ;;  %v1773_v14 = vmul.f32 -1.442695, %v253_v10 }
 0x216   :  { %v225_v12 = vpop.f32.mrf.mxu3 }
 0x217   :  { %1867 = vpow2.f32 %v1773_v14 }
 0x21b   :  { %v1866_v13 = vpop.eup %1865 }
 0x21c   :  { %276 = vrot.lane.b32.xlu1 %v1866_v13, %s2063_s18 }
 0x21d   :  { %v1868_v15 = vpop.eup %1867 }
 0x21e   :  { %v257_v17 = vadd.f32 1.0, %v1868_v15 }
 0x220   :  { %1869 = vrcp.f32 %v257_v17  ;;  %v269_v25 = vand.u32 2147483648, %v257_v17  ;;  %vm263_vm6 = vweird.f32 %v257_v17  ;;  %v267_v26 = vand.u32 2147483647, %v257_v17 }
 0x222   :  { %v270_v28 = vor.u32 1.1754944e-38, %v269_v25  ;;  %vm268_vm8 = vcmp.eq.f32.partialorder %v267_v26, 8.507059e+37 }
 0x226   :  { %v1870_v18 = vpop.eup %1869 }
 0x227   :  { %v259_v20 = vmul.f32 %v1870_v18, %v257_v17  ;;  %vm264_vm5 = vweird.f32 %v1870_v18 }
 0x228   :  { %vm265_vm7 = vmor %vm263_vm6, %vm264_vm5 }
 0x229   :  { %v260_v21 = vsub.f32 1.0, %v259_v20 }
 0x22b   :  { %v261_v22 = vmul.f32 %v1870_v18, %v260_v21 }
 0x22d   :  { %v262_v23 = vadd.f32 %v1870_v18, %v261_v22 }
 0x22f   :  { %v266_v27 = vsel %vm265_vm7, %v1870_v18, %v262_v23 }
 0x230   :  { %v271_v30 = vsel %vm268_vm8, %v270_v28, %v266_v27 }
 0x231   :  { %v274_v32 = vmul.f32 0.0, %v271_v30 }
 0x28e   :  { %v277_v29 = vpop.permute.xlu1 %276 }
 0x28f   :  { %v279_v31 = vmul.f32 %v277_v29, %v271_v30 }
 0x291   :  { %281 = vrot.lane.b32.xlu2 %v279_v31, %s2064_s19 }
 0x2eb   :  { %v282_v33 = vpop.permute.xlu2 %281 }
 0x2ec   :  { %v2254_v34 = vadd.f32 %v282_v33, %v274_v32 }
 0x2ee   :  { %1871 = vtanh.f32 %v2254_v34  ;;  %v292_v35 = vpack.c.bf16 %v2254_v34, %v2254_v34 }
 0x2f0   :  { %313 = vrot.lane.b32.xlu2 %v292_v35, %s2065_s20 }
 0x2f4   :  { %v1872_v36 = vpop.eup %1871 }
 0x2f5   :  { %287 = vrot.lane.b32.xlu0 %v1872_v36, %s2063_s18 }
 0x2fd   :  { %375 = vperm.xlu0 %1837, %v370_v48  }
 0x305   :  { %382 = vperm.xlu0 %1837, %v377_v49  }
 0x30d   :  { %1838 = vset.pattern.permute.xlu0 %v2062_v3 }
 0x34a   :  { %v314_v38 = vpop.permute.xlu2 %313 }
 0x34b   :  { %1775 = vmatmul.msk.bf16.vlgmr.msrb.gmra.mxu0 %vm73_vm9, %v314_v38 }
 0x34c   :  { %708 = vmatpush.bf16.msrb.mxu0 %v2133_v0 }
 0x350   :  { %709 = vmatpush.bf16.msrb.mxu0 %v2143_v2 }
 0x367   :  { %v288_v40 = vpop.permute.xlu0 %287 }
 0x368   :  { %v2264_v41 = vmul.f32 %v288_v40, %v271_v30 }
 0x36a   :  { %v291_v42 = vpack.c.bf16 %v2264_v41, %v2264_v41 }
 0x36c   :  { %294 = vrot.lane.b32.xlu1 %v291_v42, %s2064_s19 }
 0x36f   :  { %v376_v18 = vpop.permute.xlu0 %375 }
 0x377   :  { %v383_v26 = vpop.permute.xlu0 %382 }
 0x3c8   :  { %v327_v44 = vpop.f32.mrf.mxu0 }
 0x3d0   :  { %v329_v45 = vpop.f32.mrf.mxu0 }
 0x3de   :  { %v295_v46 = vpop.permute.xlu1 %294 }
 0x3df   :  { %1774 = vmatmul.msk.bf16.vlgmr.msrb.gmra.mxu3 %vm73_vm9, %v295_v46  ;;  %1776 = vmatmul.msk.bf16.vlgmr.msrb.gmra.mxu1 %vm73_vm9, %v295_v46 }
 0x3e0   :  { %721 = vmatpush.bf16.msrb.mxu1 %v2138_v1  ;;  %689 = vmatpush.bf16.msrb.mxu3 %v2212_v50 }
 0x3e4   :  { %722 = vmatpush.bf16.msrb.mxu1 %v2151_v4  ;;  %690 = vmatpush.bf16.msrb.mxu3 %v2218_v51 }
 0x45c   :  { %v340_v52 = vpop.f32.mrf.mxu1 }
 0x45d   :  { %v341_v54 = vadd.f32 %v340_v52, %v327_v44 }
 0x45f   :  { %v344_v55 = vadd.f32 %v2171_v11, %v341_v54 }
 0x461   :  { %v346_v56 = vrot.slane %v344_v55, 1  ;;  %v347_v57 = vperm.slane %v344_v55, 0 }
 0x462   :  { %v308_v58 = vpop.f32.mrf.mxu3 }
 0x463   :  { %v348_v59 = vperm.slane %v346_v56, 0  ;;  %v351_v60 = vadd.f32 %v347_v57, %v2177_v16 }
 0x464   :  { %v342_v61 = vpop.f32.mrf.mxu1 }
 0x465   :  { %v352_v62 = vadd.f32 %v348_v59, %v2182_v19  ;;  %1873 = vtanh.f32 %v351_v60 }
 0x467   :  { %1875 = vtanh.f32 %v352_v62 }
 0x46a   :  { %v310_v5 = vpop.f32.mrf.mxu3 }
 0x46b   :  { %v1874_v8 = vpop.eup %1873 }
 0x46c   :  { %v355_v9 = vmul.f32 %v1874_v8, %v2189_v24 }
 0x46d   :  { %v1876_v10 = vpop.eup %1875 }
 0x46e   :  { %v357_v12 = vsel %vm156_vm0, %v355_v9, 0.0  ;;  %v356_v13 = vmul.f32 %v1876_v10, %v2189_v24 }
 0x46f   :  { %358 = vadd.xlane.f32.xlu1 %v357_v12 }
 0x470   :  { %v360_v14 = vsel %vm156_vm0, %v356_v13, 0.0 }
 0x471   :  { %361 = vadd.xlane.f32.xlu2 %v360_v14 }
 0x4e2   :  { %v359_v15 = vpop.xlane.xlu1 %358 }
 0x4e3   :  { %v363_v17 = vmul.f32 1.442695, %v359_v15 }
 0x4e4   :  { %v362_v20 = vpop.xlane.xlu2 %361 }
 0x4e5   :  { %1877 = vpow2.f32 %v363_v17  ;;  %v365_v21 = vmul.f32 1.442695, %v362_v20 }
 0x4e7   :  { %1879 = vpow2.f32 %v365_v21 }
 0x4eb   :  { %v1878_v22 = vpop.eup %1877 }
 0x4ec   :  { %v2286_v23 = vmul.f32 %v1878_v22, %v376_v18  ;;  %v422_v29 = vperm.slane %v1878_v22, %v2199_v39 }
 0x4ed   :  { %v1880_v25 = vpop.eup %1879 }
 0x4ee   :  { %v388_v27 = vpack.c.bf16 %v2286_v23, %v2286_v23  ;;  %v2290_v28 = vmul.f32 %v1880_v25, %v383_v26  ;;  %v423_v30 = vperm.slane %v1880_v25, %v2199_v39 }
 0x4f0   :  { %v392_v31 = vunpack.c.l.b16 %v388_v27  ;;  %v389_v32 = vpack.c.bf16 %v2290_v28, %v2290_v28  ;;  %v424_v33 = vsel %vm203_vm1, %v423_v30, %v422_v29 }
 0x4f1   :  { %v426_v35 = vsel %vm233_vm2, %v424_v33, 0.0 }
 0x4f2   :  { %v393_v36 = vunpack.c.l.b16 %v389_v32  ;;  %427 = vadd.xlane.f32.xlu1 %v426_v35  ;;  %395 = vperm.xlu0 %1838, %v392_v31   ;;  %v1783_v35 = vld [vmem:[%s2770_s1 + $0x4] sm:$0x3] }
 0x4f4   :  { %398 = vperm.xlu2 %1836, %v393_v36   ;;  %v562_v36 = vperm.slane %v1783_v35, 0 }
 0x4fa   :  { %1839 = vset.pattern.permute.xlu0 %v2161_v6 }
 0x54e   :  { %v399_v38 = vpop.permute.xlu2 %398 }
 0x54f   :  { %v401_v42 = vperm.slane %v399_v38, %v2199_v39  ;;  %v569_v38 = vperm.slane %v1783_v35, 1 }
 0x564   :  { %v396_v40 = vpop.permute.xlu0 %395 }
 0x565   :  { %v400_v44 = vperm.slane %v396_v40, %v2199_v39  ;;  %v428_v47 = vpop.xlane.xlu1 %427 }
 0x566   :  { %1881 = vrcp.f32 %v428_v47 }
 0x567   :  { %v402_v45 = vsel %vm203_vm1, %v401_v42, %v400_v44 }
 0x568   :  { %v403_v46 = vpack.c.b16 %v402_v45, %v402_v45 }
 0x56a   :  { %1778 = vmatmul.msk.bf16.vlgmr.msrb.gmra.mxu2 %vm206_vm4, %v403_v46 }
 0x56b   :  { %798 = vmatpush.bf16.msrb.mxu2 %v2224_v53 }
 0x56c   :  { %v2304_v48 = vpop.eup %1881 }
 0x5ed   :  { %v416_v49 = vpop.f32.mrf.mxu2 }
 0x5ee   :  { %v443_v52 = vmul.f32 %v2304_v48, %v416_v49 }
 0x5f0   :  { %v444_v54 = vadd.f32 %v443_v52, %v308_v58 }
 0x5f2   :  { %v445_v55 = vadd.f32 %v2248_v7, %v444_v54 }
 0x5f4   :  { %1883 = vtanh.f32 %v445_v55  ;;  %v1779_v59 = vmul.f32 -1.442695, %v445_v55 }
 0x5f5   :  { %v418_v56 = vpop.f32.mrf.mxu2 }
 0x5f6   :  { %1885 = vpow2.f32 %v1779_v59 }
 0x5fa   :  { %v1884_v57 = vpop.eup %1883 }
 0x5fb   :  { %468 = vrot.lane.b32.xlu1 %v1884_v57, %s2063_s18 }
 0x5fc   :  { %v1886_v60 = vpop.eup %1885 }
 0x5fd   :  { %v449_v61 = vadd.f32 1.0, %v1886_v60 }
 0x5ff   :  { %1887 = vrcp.f32 %v449_v61  ;;  %v461_v12 = vand.u32 2147483648, %v449_v61  ;;  %vm455_vm11 = vweird.f32 %v449_v61  ;;  %v459_v58 = vand.u32 2147483647, %v449_v61 }
 0x601   :  { %v462_v14 = vor.u32 1.1754944e-38, %v461_v12  ;;  %vm460_vm13 = vcmp.eq.f32.partialorder %v459_v58, 8.507059e+37 }
 0x605   :  { %v1888_v62 = vpop.eup %1887 }
 0x606   :  { %v451_v5 = vmul.f32 %v1888_v62, %v449_v61  ;;  %vm456_vm10 = vweird.f32 %v1888_v62 }
 0x607   :  { %vm457_vm12 = vmor %vm455_vm11, %vm456_vm10 }
 0x608   :  { %v452_v8 = vsub.f32 1.0, %v451_v5 }
 0x60a   :  { %v453_v9 = vmul.f32 %v1888_v62, %v452_v8 }
 0x60c   :  { %v454_v10 = vadd.f32 %v1888_v62, %v453_v9 }
 0x60e   :  { %v458_v13 = vsel %vm457_vm12, %v1888_v62, %v454_v10 }
 0x60f   :  { %v463_v17 = vsel %vm460_vm13, %v462_v14, %v458_v13 }
 0x610   :  { %v466_v20 = vmul.f32 %v463_v17, %v2254_v34 }
 0x66d   :  { %v469_v15 = vpop.permute.xlu1 %468 }
 0x66e   :  { %v471_v18 = vmul.f32 %v469_v15, %v463_v17 }
 0x670   :  { %473 = vrot.lane.b32.xlu0 %v471_v18, %s2064_s19 }
 0x6e2   :  { %v474_v21 = vpop.permute.xlu0 %473 }
 0x6e3   :  { %v2311_v22 = vadd.f32 %v474_v21, %v466_v20 }
 0x6e5   :  { %1889 = vtanh.f32 %v2311_v22  ;;  %v484_v26 = vpack.c.bf16 %v2311_v22, %v2311_v22 }
 0x6eb   :  { %v1890_v25 = vpop.eup %1889 }
 0x6ec   :  { %479 = vrot.lane.b32.xlu0 %v1890_v25, %s2063_s18 }
 0x6f4   :  { %505 = vrot.lane.b32.xlu0 %v484_v26, %s2065_s20 }
 0x6fc   :  { %567 = vperm.xlu0 %1839, %v562_v36  }
 0x704   :  { %574 = vperm.xlu0 %1839, %v569_v38  }
 0x70c   :  { %1840 = vset.pattern.permute.xlu0 %v2062_v3 }
 0x75e   :  { %v480_v27 = vpop.permute.xlu0 %479 }
 0x75f   :  { %v2318_v29 = vmul.f32 %v480_v27, %v463_v17 }
 0x761   :  { %v483_v30 = vpack.c.bf16 %v2318_v29, %v2318_v29 }
 0x763   :  { %486 = vrot.lane.b32.xlu2 %v483_v30, %s2064_s19 }
 0x766   :  { %v506_v34 = vpop.permute.xlu0 %505 }
 0x767   :  { %1781 = vmatmul.msk.bf16.vlgmr.msra.gmra.mxu0 %vm73_vm9, %v506_v34 }
 0x768   :  { %900 = vmatpush.bf16.msra.mxu0 %v2133_v0 }
 0x76c   :  { %901 = vmatpush.bf16.msra.mxu0 %v2143_v2 }
 0x76e   :  { %v568_v10 = vpop.permute.xlu0 %567 }
 0x776   :  { %v575_v17 = vpop.permute.xlu0 %574 }
 0x7bd   :  { %v487_v31 = vpop.permute.xlu2 %486 }
 0x7be   :  { %1780 = vmatmul.msk.bf16.vlgmr.msra.gmra.mxu3 %vm73_vm9, %v487_v31  ;;  %1782 = vmatmul.msk.bf16.vlgmr.msra.gmra.mxu1 %vm73_vm9, %v487_v31 }
 0x7bf   :  { %913 = vmatpush.bf16.msra.mxu1 %v2138_v1  ;;  %881 = vmatpush.bf16.msra.mxu3 %v2212_v50 }
 0x7c3   :  { %914 = vmatpush.bf16.msra.mxu1 %v2151_v4  ;;  %882 = vmatpush.bf16.msra.mxu3 %v2218_v51 }
 0x7e4   :  { %v519_v32 = vpop.f32.mrf.mxu0 }
 0x7ec   :  { %v521_v33 = vpop.f32.mrf.mxu0 }
 0x83b   :  { %v532_v40 = vpop.f32.mrf.mxu1 }
 0x83c   :  { %v533_v42 = vadd.f32 %v532_v40, %v519_v32 }
 0x83e   :  { %v536_v44 = vadd.f32 %v2171_v11, %v533_v42 }
 0x840   :  { %v538_v45 = vrot.slane %v536_v44, 1  ;;  %v539_v46 = vperm.slane %v536_v44, 0 }
 0x841   :  { %v500_v47 = vpop.f32.mrf.mxu3 }
 0x842   :  { %v540_v49 = vperm.slane %v538_v45, 0  ;;  %v543_v52 = vadd.f32 %v539_v46, %v2177_v16 }
 0x843   :  { %v534_v54 = vpop.f32.mrf.mxu1 }
 0x844   :  { %v544_v55 = vadd.f32 %v540_v49, %v2182_v19  ;;  %1891 = vtanh.f32 %v543_v52 }
 0x846   :  { %1893 = vtanh.f32 %v544_v55 }
 0x849   :  { %v502_v56 = vpop.f32.mrf.mxu3 }
 0x84a   :  { %v1892_v57 = vpop.eup %1891 }
 0x84b   :  { %v547_v59 = vmul.f32 %v1892_v57, %v2189_v24 }
 0x84c   :  { %v1894_v60 = vpop.eup %1893 }
 0x84d   :  { %v549_v61 = vsel %vm156_vm0, %v547_v59, 0.0  ;;  %v548_v62 = vmul.f32 %v1894_v60, %v2189_v24 }
 0x84e   :  { %550 = vadd.xlane.f32.xlu2 %v549_v61 }
 0x84f   :  { %v552_v5 = vsel %vm156_vm0, %v548_v62, 0.0 }
 0x850   :  { %553 = vadd.xlane.f32.xlu1 %v552_v5 }
 0x8c1   :  { %v551_v8 = vpop.xlane.xlu2 %550 }
 0x8c2   :  { %v555_v9 = vmul.f32 1.442695, %v551_v8 }
 0x8c3   :  { %v554_v12 = vpop.xlane.xlu1 %553 }
 0x8c4   :  { %1895 = vpow2.f32 %v555_v9  ;;  %v557_v58 = vmul.f32 1.442695, %v554_v12 }
 0x8c6   :  { %1897 = vpow2.f32 %v557_v58 }
 0x8ca   :  { %v1896_v13 = vpop.eup %1895 }
 0x8cb   :  { %v2343_v14 = vmul.f32 %v1896_v13, %v568_v10  ;;  %v614_v30 = vperm.slane %v1896_v13, %v2199_v39 }
 0x8cc   :  { %v1898_v15 = vpop.eup %1897 }
 0x8cd   :  { %v580_v18 = vpack.c.bf16 %v2343_v14, %v2343_v14  ;;  %v2347_v20 = vmul.f32 %v1898_v15, %v575_v17  ;;  %v615_v27 = vperm.slane %v1898_v15, %v2199_v39 }
 0x8cf   :  { %v584_v21 = vunpack.c.l.b16 %v580_v18  ;;  %v581_v25 = vpack.c.bf16 %v2347_v20, %v2347_v20  ;;  %v616_v34 = vsel %vm203_vm1, %v615_v27, %v614_v30  ;;  %v1789_v27 = vld [vmem:[%s2770_s1 + $0x6] sm:$0x3] }
 0x8d0   :  { %v618_v31 = vsel %vm233_vm2, %v616_v34, 0.0  ;;  %v754_v30 = vperm.slane %v1789_v27, 0 }
 0x8d1   :  { %v585_v26 = vunpack.c.l.b16 %v581_v25  ;;  %587 = vperm.xlu0 %1840, %v584_v21  }
 0x8d3   :  { %590 = vperm.xlu2 %1836, %v585_v26  }
 0x8d9   :  { %1841 = vset.pattern.permute.xlu0 %v2161_v6 }
 0x8fb   :  { %619 = vadd.xlane.f32.xlu0 %v618_v31 }
 0x92d   :  { %v591_v32 = vpop.permute.xlu2 %590 }
 0x92e   :  { %v593_v35 = vperm.slane %v591_v32, %v2199_v39 }
 0x943   :  { %v588_v33 = vpop.permute.xlu0 %587 }
 0x944   :  { %v592_v36 = vperm.slane %v588_v33, %v2199_v39 }
 0x946   :  { %v594_v38 = vsel %vm203_vm1, %v593_v35, %v592_v36 }
 0x947   :  { %v595_v40 = vpack.c.b16 %v594_v38, %v594_v38 }
 0x949   :  { %1784 = vmatmul.msk.bf16.vlgmr.msra.gmra.mxu2 %vm206_vm4, %v595_v40 }
 0x94a   :  { %990 = vmatpush.bf16.msra.mxu2 %v2224_v53 }
 0x96e   :  { %v620_v42 = vpop.xlane.xlu0 %619 }
 0x96f   :  { %1899 = vrcp.f32 %v620_v42 }
 0x975   :  { %v2361_v44 = vpop.eup %1899 }
 0x9cc   :  { %v608_v45 = vpop.f32.mrf.mxu2 }
 0x9cd   :  { %v635_v46 = vmul.f32 %v2361_v44, %v608_v45 }
 0x9cf   :  { %v636_v49 = vadd.f32 %v635_v46, %v500_v47 }
 0x9d1   :  { %v637_v52 = vadd.f32 %v2248_v7, %v636_v49 }
 0x9d3   :  { %1901 = vtanh.f32 %v637_v52  ;;  %v1785_v56 = vmul.f32 -1.442695, %v637_v52 }
 0x9d4   :  { %v610_v54 = vpop.f32.mrf.mxu2 }
 0x9d5   :  { %1903 = vpow2.f32 %v1785_v56 }
 0x9d9   :  { %v1902_v55 = vpop.eup %1901 }
 0x9da   :  { %660 = vrot.lane.b32.xlu1 %v1902_v55, %s2063_s18 }
 0x9db   :  { %v1904_v57 = vpop.eup %1903 }
 0x9dc   :  { %v641_v59 = vadd.f32 1.0, %v1904_v57 }
 0x9de   :  { %1905 = vrcp.f32 %v641_v59  ;;  %v653_v9 = vand.u32 2147483648, %v641_v59  ;;  %vm647_vm15 = vweird.f32 %v641_v59  ;;  %v651_v47 = vand.u32 2147483647, %v641_v59 }
 0x9e0   :  { %v654_v12 = vor.u32 1.1754944e-38, %v653_v9  ;;  %vm652_vm6 = vcmp.eq.f32.partialorder %v651_v47, 8.507059e+37 }
 0x9e4   :  { %v1906_v60 = vpop.eup %1905 }
 0x9e5   :  { %v643_v61 = vmul.f32 %v1906_v60, %v641_v59  ;;  %vm648_vm14 = vweird.f32 %v1906_v60 }
 0x9e6   :  { %vm649_vm5 = vmor %vm647_vm15, %vm648_vm14 }
 0x9e7   :  { %v644_v62 = vsub.f32 1.0, %v643_v61  ;;  %v761_v61 = vperm.slane %v1789_v27, 1 }
 0x9e9   :  { %v645_v5 = vmul.f32 %v1906_v60, %v644_v62 }
 0x9eb   :  { %v646_v8 = vadd.f32 %v1906_v60, %v645_v5 }
 0x9ed   :  { %v650_v10 = vsel %vm649_vm5, %v1906_v60, %v646_v8 }
 0x9ee   :  { %v655_v13 = vsel %vm652_vm6, %v654_v12, %v650_v10 }
 0x9ef   :  { %v658_v17 = vmul.f32 %v655_v13, %v2311_v22 }
 0xa4c   :  { %v661_v58 = vpop.permute.xlu1 %660 }
 0xa4d   :  { %v663_v15 = vmul.f32 %v661_v58, %v655_v13 }
 0xa4f   :  { %665 = vrot.lane.b32.xlu2 %v663_v15, %s2064_s19 }
 0xaa9   :  { %v666_v18 = vpop.permute.xlu2 %665 }
 0xaaa   :  { %v2368_v21 = vadd.f32 %v666_v18, %v658_v17 }
 0xaac   :  { %1907 = vtanh.f32 %v2368_v21  ;;  %v676_v26 = vpack.c.bf16 %v2368_v21, %v2368_v21 }
 0xab2   :  { %v1908_v25 = vpop.eup %1907 }
 0xab3   :  { %671 = vrot.lane.b32.xlu1 %v1908_v25, %s2063_s18 }
 0xabb   :  { %697 = vrot.lane.b32.xlu1 %v676_v26, %s2065_s20 }
 0xac3   :  { %759 = vperm.xlu1 %1835, %v754_v30  }
 0xacb   :  { %1842 = vset.pattern.permute.xlu1 %v2062_v3 }
 0xb25   :  { %v672_v22 = vpop.permute.xlu1 %671 }
 0xb26   :  { %v2379_v34 = vmul.f32 %v672_v22, %v655_v13 }
 0xb28   :  { %v675_v31 = vpack.c.bf16 %v2379_v34, %v2379_v34 }
 0xb2a   :  { %678 = vrot.lane.b32.xlu2 %v675_v31, %s2064_s19 }
 0xb2d   :  { %v698_v32 = vpop.permute.xlu1 %697 }
 0xb2e   :  { %1787 = vmatmul.msk.bf16.vlgmr.msrb.gmra.mxu0 %vm73_vm9, %v698_v32 }
 0xb2f   :  { %1092 = vmatpush.bf16.msrb.mxu0 %v2133_v0 }
 0xb33   :  { %1093 = vmatpush.bf16.msrb.mxu0 %v2143_v2 }
 0xb35   :  { %v760_v47 = vpop.permute.xlu1 %759 }
 0xb84   :  { %v679_v33 = vpop.permute.xlu2 %678 }
 0xb85   :  { %1786 = vmatmul.msk.bf16.vlgmr.msrb.gmra.mxu3 %vm73_vm9, %v679_v33  ;;  %1788 = vmatmul.msk.bf16.vlgmr.msrb.gmra.mxu1 %vm73_vm9, %v679_v33 }
 0xb86   :  { %1105 = vmatpush.bf16.msrb.mxu1 %v2138_v1  ;;  %1073 = vmatpush.bf16.msrb.mxu3 %v2212_v50 }
 0xb8a   :  { %1074 = vmatpush.bf16.msrb.mxu3 %v2218_v51  ;;  %1106 = vmatpush.bf16.msrb.mxu1 %v2151_v4 }
 0xbab   :  { %v711_v35 = vpop.f32.mrf.mxu0 }
 0xbb3   :  { %v713_v36 = vpop.f32.mrf.mxu0 }
 0xc02   :  { %v724_v38 = vpop.f32.mrf.mxu1 }
 0xc03   :  { %v725_v40 = vadd.f32 %v724_v38, %v711_v35 }
 0xc05   :  { %v728_v0 = vadd.f32 %v2171_v11, %v725_v40 }
 0xc07   :  { %v730_v2 = vrot.slane %v728_v0, 1  ;;  %v731_v42 = vperm.slane %v728_v0, 0 }
 0xc08   :  { %v692_v45 = vpop.f32.mrf.mxu3 }
 0xc09   :  { %v732_v46 = vperm.slane %v730_v2, 0  ;;  %v735_v49 = vadd.f32 %v731_v42, %v2177_v16 }
 0xc0a   :  { %v726_v52 = vpop.f32.mrf.mxu1 }
 0xc0b   :  { %v736_v1 = vadd.f32 %v732_v46, %v2182_v19  ;;  %1909 = vtanh.f32 %v735_v49 }
 0xc0d   :  { %1911 = vtanh.f32 %v736_v1 }
 0xc10   :  { %v694_v54 = vpop.f32.mrf.mxu3 }
 0xc11   :  { %v1910_v55 = vpop.eup %1909 }
 0xc12   :  { %v739_v4 = vmul.f32 %v1910_v55, %v2189_v24 }
 0xc13   :  { %v1912_v56 = vpop.eup %1911 }
 0xc14   :  { %v741_v57 = vsel %vm156_vm0, %v739_v4, 0.0  ;;  %v740_v59 = vmul.f32 %v1912_v56, %v2189_v24 }
 0xc15   :  { %742 = vadd.xlane.f32.xlu2 %v741_v57 }
 0xc16   :  { %v744_v60 = vsel %vm156_vm0, %v740_v59, 0.0 }
 0xc17   :  { %745 = vadd.xlane.f32.xlu0 %v744_v60 }
 0xc2b   :  { %766 = vperm.xlu0 %1841, %v761_v61  }
 0xc88   :  { %v743_v62 = vpop.xlane.xlu2 %742 }
 0xc89   :  { %v747_v5 = vmul.f32 1.442695, %v743_v62 }
 0xc8a   :  { %v746_v8 = vpop.xlane.xlu0 %745 }
 0xc8b   :  { %1913 = vpow2.f32 %v747_v5  ;;  %v749_v12 = vmul.f32 1.442695, %v746_v8 }
 0xc8d   :  { %1915 = vpow2.f32 %v749_v12 }
 0xc91   :  { %v1914_v9 = vpop.eup %1913 }
 0xc92   :  { %v2400_v10 = vmul.f32 %v1914_v9, %v760_v47  ;;  %v806_v30 = vperm.slane %v1914_v9, %v2199_v39 }
 0xc93   :  { %v1916_v15 = vpop.eup %1915 }
 0xc94   :  { %v772_v58 = vpack.c.bf16 %v2400_v10, %v2400_v10  ;;  %v807_v27 = vperm.slane %v1916_v15, %v2199_v39 }
 0xc96   :  { %v776_v13 = vunpack.c.l.b16 %v772_v58  ;;  %v808_v22 = vsel %vm203_vm1, %v807_v27, %v806_v30  ;;  %v1795_v27 = vld [vmem:[%s2770_s1 + $0x8] sm:$0x3] }
 0xc97   :  { %v810_v31 = vsel %vm233_vm2, %v808_v22, 0.0  ;;  %v946_v30 = vperm.slane %v1795_v27, 0 }
 0xc98   :  { %779 = vperm.xlu1 %1842, %v776_v13  }
 0xc9d   :  { %v767_v17 = vpop.permute.xlu0 %766 }
 0xc9e   :  { %v2404_v18 = vmul.f32 %v1916_v15, %v767_v17 }
 0xca0   :  { %v773_v25 = vpack.c.bf16 %v2404_v18, %v2404_v18 }
 0xca2   :  { %v777_v26 = vunpack.c.l.b16 %v773_v25 }
 0xca4   :  { %782 = vperm.xlu1 %1842, %v777_v26  }
 0xcac   :  { %1843 = vset.pattern.permute.xlu1 %v2161_v6 }
 0xcce   :  { %811 = vadd.xlane.f32.xlu1 %v810_v31 }
 0xd0a   :  { %v780_v32 = vpop.permute.xlu1 %779 }
 0xd0b   :  { %v784_v35 = vperm.slane %v780_v32, %v2199_v39 }
 0xd16   :  { %v783_v33 = vpop.permute.xlu1 %782 }
 0xd17   :  { %v785_v36 = vperm.slane %v783_v33, %v2199_v39  ;;  %v2445_v33 = vld [vmem:[%s2772_s3 + $0x8] sm:$0xff] }
 0xd19   :  { %v786_v38 = vsel %vm203_vm1, %v785_v36, %v784_v35  ;;  %v2451_v35 = vld [vmem:[%s2772_s3] sm:$0xff] }
 0xd1a   :  { %v787_v40 = vpack.c.b16 %v786_v38, %v786_v38  ;;  %v2459_v38 = vld [vmem:[%s2771_s2 + $0x8] sm:$0xff] }
 0xd1c   :  { %1790 = vmatmul.msk.bf16.vlgmr.msrb.gmra.mxu2 %vm206_vm4, %v787_v40  ;;  %v2466_v40 = vld [vmem:[%s2771_s2] sm:$0xff] }
 0xd1d   :  { %1182 = vmatpush.bf16.msrb.mxu2 %v2224_v53 }
 0xd41   :  { %v812_v0 = vpop.xlane.xlu1 %811 }
 0xd42   :  { %1917 = vrcp.f32 %v812_v0 }
 0xd48   :  { %v2418_v2 = vpop.eup %1917 }
 0xd9f   :  { %v800_v42 = vpop.f32.mrf.mxu2 }
 0xda0   :  { %v827_v46 = vmul.f32 %v2418_v2, %v800_v42 }
 0xda2   :  { %v828_v49 = vadd.f32 %v827_v46, %v692_v45 }
 0xda4   :  { %v829_v52 = vadd.f32 %v2248_v7, %v828_v49 }
 0xda6   :  { %1919 = vtanh.f32 %v829_v52  ;;  %v1791_v55 = vmul.f32 -1.442695, %v829_v52 }
 0xda7   :  { %v802_v1 = vpop.f32.mrf.mxu2 }
 0xda8   :  { %1921 = vpow2.f32 %v1791_v55 }
 0xdac   :  { %v1920_v54 = vpop.eup %1919 }
 0xdad   :  { %852 = vrot.lane.b32.xlu2 %v1920_v54, %s2063_s18 }
 0xdae   :  { %v1922_v4 = vpop.eup %1921 }
 0xdaf   :  { %v833_v56 = vadd.f32 1.0, %v1922_v4 }
 0xdb1   :  { %1923 = vrcp.f32 %v833_v56  ;;  %v845_v5 = vand.u32 2147483648, %v833_v56  ;;  %vm839_vm8 = vweird.f32 %v833_v56  ;;  %v843_v45 = vand.u32 2147483647, %v833_v56 }
 0xdb3   :  { %v846_v9 = vor.u32 1.1754944e-38, %v845_v5  ;;  %vm844_vm11 = vcmp.eq.f32.partialorder %v843_v45, 8.507059e+37  ;;  %v953_v45 = vperm.slane %v1795_v27, 1 }
 0xdb7   :  { %v1924_v57 = vpop.eup %1923 }
 0xdb8   :  { %v835_v59 = vmul.f32 %v1924_v57, %v833_v56  ;;  %vm840_vm7 = vweird.f32 %v1924_v57 }
 0xdb9   :  { %vm841_vm10 = vmor %vm839_vm8, %vm840_vm7 }
 0xdba   :  { %v836_v60 = vsub.f32 1.0, %v835_v59 }
 0xdbc   :  { %v837_v61 = vmul.f32 %v1924_v57, %v836_v60 }
 0xdbe   :  { %v838_v62 = vadd.f32 %v1924_v57, %v837_v61 }
 0xdc0   :  { %v842_v8 = vsel %vm841_vm10, %v1924_v57, %v838_v62 }
 0xdc1   :  { %v847_v12 = vsel %vm844_vm11, %v846_v9, %v842_v8 }
 0xdc2   :  { %v850_v13 = vmul.f32 %v847_v12, %v2368_v21 }
 0xe07   :  { %v853_v47 = vpop.permute.xlu2 %852 }
 0xe08   :  { %v855_v58 = vmul.f32 %v853_v47, %v847_v12 }
 0xe0a   :  { %857 = vrot.lane.b32.xlu0 %v855_v58, %s2064_s19 }
 0xe7c   :  { %v858_v15 = vpop.permute.xlu0 %857 }
 0xe7d   :  { %v2425_v17 = vadd.f32 %v858_v15, %v850_v13 }
 0xe7f   :  { %1925 = vtanh.f32 %v2425_v17  ;;  %v868_v26 = vpack.c.bf16 %v2425_v17, %v2425_v17 }
 0xe85   :  { %v1926_v25 = vpop.eup %1925 }
 0xe86   :  { %863 = vrot.lane.b32.xlu0 %v1926_v25, %s2063_s18 }
 0xe8e   :  { %889 = vrot.lane.b32.xlu0 %v868_v26, %s2065_s20 }
 0xe96   :  { %951 = vperm.xlu0 %1841, %v946_v30  }
 0xe9e   :  { %1844 = vset.pattern.permute.xlu0 %v2062_v3 }
 0xef8   :  { %v864_v21 = vpop.permute.xlu0 %863 }
 0xef9   :  { %v2436_v22 = vmul.f32 %v864_v21, %v847_v12 }
 0xefb   :  { %v867_v31 = vpack.c.bf16 %v2436_v22, %v2436_v22 }
 0xefd   :  { %870 = vrot.lane.b32.xlu2 %v867_v31, %s2064_s19 }
 0xf00   :  { %v890_v32 = vpop.permute.xlu0 %889 }
 0xf01   :  { %1793 = vmatmul.msk.bf16.vlgmr.msra.gmra.mxu0 %vm73_vm9, %v890_v32 }
 0xf02   :  { %1284 = vmatpush.bf16.msra.mxu0 %v2445_v33 }
 0xf06   :  { %1285 = vmatpush.bf16.msra.mxu0 %v2451_v35 }
 0xf08   :  { %v952_v12 = vpop.permute.xlu0 %951 }
 0xf57   :  { %v871_v36 = vpop.permute.xlu2 %870 }
 0xf58   :  { %1792 = vmatmul.msk.bf16.vlgmr.msra.gmra.mxu3 %vm73_vm9, %v871_v36  ;;  %1794 = vmatmul.msk.bf16.vlgmr.msra.gmra.mxu1 %vm73_vm9, %v871_v36 }
 0xf59   :  { %1297 = vmatpush.bf16.msra.mxu1 %v2459_v38  ;;  %1265 = vmatpush.bf16.msra.mxu3 %v2212_v50 }
 0xf5d   :  { %1298 = vmatpush.bf16.msra.mxu1 %v2466_v40  ;;  %1266 = vmatpush.bf16.msra.mxu3 %v2218_v51 }
 0xf7e   :  { %v903_v0 = vpop.f32.mrf.mxu0 }
 0xf86   :  { %v905_v42 = vpop.f32.mrf.mxu0 }
 0xfd5   :  { %v916_v46 = vpop.f32.mrf.mxu1 }
 0xfd6   :  { %v917_v49 = vadd.f32 %v916_v46, %v903_v0  ;;  %v1801_v0 = vld [vmem:[%s2770_s1 + $0xa] sm:$0x3] }
 0xfd7   :  { %v1138_v42 = vperm.slane %v1801_v0, 0  ;;  %v1145_v46 = vperm.slane %v1801_v0, 1 }
 0xfd8   :  { %v920_v52 = vadd.f32 %v2171_v11, %v917_v49 }
 0xfda   :  { %v922_v1 = vrot.slane %v920_v52, 1  ;;  %v923_v54 = vperm.slane %v920_v52, 0 }
 0xfdb   :  { %v884_v55 = vpop.f32.mrf.mxu3 }
 0xfdc   :  { %v924_v4 = vperm.slane %v922_v1, 0  ;;  %v927_v50 = vadd.f32 %v923_v54, %v2177_v16 }
 0xfdd   :  { %v918_v56 = vpop.f32.mrf.mxu1 }
 0xfde   :  { %v928_v57 = vadd.f32 %v924_v4, %v2182_v19  ;;  %1927 = vtanh.f32 %v927_v50 }
 0xfe0   :  { %1929 = vtanh.f32 %v928_v57 }
 0xfe3   :  { %v886_v59 = vpop.f32.mrf.mxu3 }
 0xfe4   :  { %v1928_v60 = vpop.eup %1927 }
 0xfe5   :  { %v931_v51 = vmul.f32 %v1928_v60, %v2189_v24 }
 0xfe6   :  { %v1930_v61 = vpop.eup %1929 }
 0xfe7   :  { %v933_v62 = vsel %vm156_vm0, %v931_v51, 0.0  ;;  %v932_v11 = vmul.f32 %v1930_v61, %v2189_v24 }
 0xfe8   :  { %934 = vadd.xlane.f32.xlu1 %v933_v62 }
 0xfe9   :  { %v936_v5 = vsel %vm156_vm0, %v932_v11, 0.0 }
 0xfea   :  { %937 = vadd.xlane.f32.xlu2 %v936_v5 }
0x1001   :  { %958 = vperm.xlu1 %1843, %v953_v45  }
0x105b   :  { %v935_v16 = vpop.xlane.xlu1 %934 }
0x105c   :  { %v939_v8 = vmul.f32 1.442695, %v935_v16 }
0x105d   :  { %v938_v19 = vpop.xlane.xlu2 %937 }
0x105e   :  { %1931 = vpow2.f32 %v939_v8  ;;  %v941_v9 = vmul.f32 1.442695, %v938_v19 }
0x1060   :  { %1933 = vpow2.f32 %v941_v9 }
0x1064   :  { %v1932_v47 = vpop.eup %1931 }
0x1065   :  { %v2477_v58 = vmul.f32 %v1932_v47, %v952_v12  ;;  %v998_v15 = vperm.slane %v1932_v47, %v2199_v39 }
0x1066   :  { %v1934_v13 = vpop.eup %1933 }
0x1067   :  { %v999_v24 = vperm.slane %v1934_v13, %v2199_v39  ;;  %v964_v25 = vpack.c.bf16 %v2477_v58, %v2477_v58 }
0x1069   :  { %v1000_v26 = vsel %vm203_vm1, %v999_v24, %v998_v15  ;;  %v968_v27 = vunpack.c.l.b16 %v964_v25 }
0x106a   :  { %v1002_v30 = vsel %vm233_vm2, %v1000_v26, 0.0 }
0x106b   :  { %1003 = vadd.xlane.f32.xlu1 %v1002_v30  ;;  %971 = vperm.xlu0 %1844, %v968_v27  }
0x1073   :  { %v959_v21 = vpop.permute.xlu1 %958 }
0x1074   :  { %v2485_v31 = vmul.f32 %v1934_v13, %v959_v21 }
0x1076   :  { %v965_v32 = vpack.c.bf16 %v2485_v31, %v2485_v31 }
0x1078   :  { %v969_v36 = vunpack.c.l.b16 %v965_v32 }
0x107a   :  { %974 = vperm.xlu0 %1844, %v969_v36  }
0x1082   :  { %1848 = vset.pattern.permute.xlu0 %v2161_v6 }
0x1084   :  { %1143 = vperm.xlu1 %1843, %v1138_v42  }
0x108c   :  { %1150 = vperm.xlu1 %1843, %v1145_v46  }
0x1094   :  { %1845 = vset.pattern.permute.xlu1 %v2062_v3 }
0x10dd   :  { %v972_v49 = vpop.permute.xlu0 %971 }
0x10de   :  { %v976_v1 = vperm.slane %v972_v49, %v2199_v39  ;;  %v1004_v56 = vpop.xlane.xlu1 %1003  ;;  %v2003_v49 = vld [vmem:[%s2776_s7 + $0x8] sm:$0xff] }
0x10df   :  { %1935 = vrcp.f32 %v1004_v56 }
0x10e5   :  { %v2499_v57 = vpop.eup %1935 }
0x10ec   :  { %v975_v52 = vpop.permute.xlu0 %974 }
0x10ed   :  { %v977_v54 = vperm.slane %v975_v52, %v2199_v39  ;;  %v2004_v52 = vld [vmem:[%s2776_s7] sm:$0xff] }
0x10ef   :  { %v978_v4 = vsel %vm203_vm1, %v977_v54, %v976_v1 }
0x10f0   :  { %v979_v50 = vpack.c.b16 %v978_v4, %v978_v4 }
0x10f2   :  { %1796 = vmatmul.msk.bf16.vlgmr.msra.gmra.mxu2 %vm206_vm4, %v979_v50 }
0x10f3   :  { %1374 = vmatpush.bf16.msra.mxu2 %v2224_v53 }
0x1175   :  { %v992_v59 = vpop.f32.mrf.mxu2 }
0x1176   :  { %v1019_v60 = vmul.f32 %v2499_v57, %v992_v59 }
0x1178   :  { %v1020_v51 = vadd.f32 %v1019_v60, %v884_v55 }
0x117a   :  { %v1021_v61 = vadd.f32 %v2248_v7, %v1020_v51 }
0x117c   :  { %1937 = vtanh.f32 %v1021_v61  ;;  %v1797_v5 = vmul.f32 -1.442695, %v1021_v61 }
0x117d   :  { %v994_v62 = vpop.f32.mrf.mxu2 }
0x117e   :  { %1939 = vpow2.f32 %v1797_v5  ;;  %v2548_v5 = vld [vmem:[%s2769_s0 + $0x4] sm:$0xf] }
0x1182   :  { %v1938_v11 = vpop.eup %1937 }
0x1183   :  { %1044 = vrot.lane.b32.xlu0 %v1938_v11, %s2063_s18 }
0x1184   :  { %v1940_v45 = vpop.eup %1939 }
0x1185   :  { %v1025_v16 = vadd.f32 1.0, %v1940_v45 }
0x1187   :  { %1941 = vrcp.f32 %v1025_v16  ;;  %v1037_v13 = vand.u32 2147483648, %v1025_v16  ;;  %vm1031_vm13 = vweird.f32 %v1025_v16  ;;  %v1035_v55 = vand.u32 2147483647, %v1025_v16 }
0x1189   :  { %v1038_v15 = vor.u32 1.1754944e-38, %v1037_v13  ;;  %vm1036_vm15 = vcmp.eq.f32.partialorder %v1035_v55, 8.507059e+37 }
0x118d   :  { %v1942_v8 = vpop.eup %1941 }
0x118e   :  { %v1027_v19 = vmul.f32 %v1942_v8, %v1025_v16  ;;  %vm1032_vm12 = vweird.f32 %v1942_v8 }
0x118f   :  { %vm1033_vm14 = vmor %vm1031_vm13, %vm1032_vm12 }
0x1190   :  { %v1028_v9 = vsub.f32 1.0, %v1027_v19 }
0x1192   :  { %v1029_v47 = vmul.f32 %v1942_v8, %v1028_v9 }
0x1194   :  { %v1030_v12 = vadd.f32 %v1942_v8, %v1029_v47 }
0x1196   :  { %v1034_v7 = vsel %vm1033_vm14, %v1942_v8, %v1030_v12  ;;  %v2554_v8 = vld [vmem:[%s2774_s5] ss:$0 sm:$0xff] }
0x1197   :  { %v1039_v25 = vsel %vm1036_vm15, %v1038_v15, %v1034_v7  ;;  %v1144_v7 = vpop.permute.xlu1 %1143 }
0x1198   :  { %v1042_v27 = vmul.f32 %v1039_v25, %v2425_v17 }
0x11f5   :  { %v1045_v24 = vpop.permute.xlu0 %1044 }
0x11f6   :  { %v1047_v26 = vmul.f32 %v1045_v24, %v1039_v25 }
0x11f8   :  { %1049 = vrot.lane.b32.xlu2 %v1047_v26, %s2064_s19 }
0x1252   :  { %v1050_v30 = vpop.permute.xlu2 %1049 }
0x1253   :  { %v2506_v21 = vadd.f32 %v1050_v30, %v1042_v27 }
0x1255   :  { %1943 = vtanh.f32 %v2506_v21  ;;  %v1060_v46 = vpack.c.bf16 %v2506_v21, %v2506_v21 }
0x125b   :  { %v1944_v32 = vpop.eup %1943 }
0x125c   :  { %1055 = vrot.lane.b32.xlu0 %v1944_v32, %s2063_s18  ;;  %v1151_v32 = vpop.permute.xlu1 %1150 }
0x12ce   :  { %v1056_v36 = vpop.permute.xlu0 %1055 }
0x12cf   :  { %v2510_v0 = vmul.f32 %v1056_v36, %v1039_v25 }
0x12d1   :  { %v1059_v42 = vpack.c.bf16 %v2510_v0, %v2510_v0 }
0x12d3   :  { %1062 = vrot.lane.b32.xlu0 %v1059_v42, %s2064_s19 }
0x12db   :  { %1081 = vrot.lane.b32.xlu0 %v1060_v46, %s2065_s20 }
0x1345   :  { %v1063_v17 = vpop.permute.xlu0 %1062 }
0x1346   :  { %1798 = vmatmul.msk.bf16.vlgmr.msrb.gmra.mxu3 %vm73_vm9, %v1063_v17  ;;  %1800 = vmatmul.msk.bf16.vlgmr.msrb.gmra.mxu1 %vm73_vm9, %v1063_v17 }
0x1347   :  { %1489 = vmatpush.bf16.msrb.mxu1 %v2459_v38  ;;  %1457 = vmatpush.bf16.msrb.mxu3 %v2003_v49 }
0x134b   :  { %1490 = vmatpush.bf16.msrb.mxu1 %v2466_v40  ;;  %1458 = vmatpush.bf16.msrb.mxu3 %v2004_v52  ;;  %v2536_v40 = vld [vmem:[%s2773_s4] ss:$0 sm:$0xff] }
0x134d   :  { %v1082_v1 = vpop.permute.xlu0 %1081 }
0x134e   :  { %1799 = vmatmul.msk.bf16.vlgmr.msrb.gmra.mxu0 %vm73_vm9, %v1082_v1 }
0x134f   :  { %1476 = vmatpush.bf16.msrb.mxu0 %v2445_v33  ;;  %v2542_v33 = vld [vmem:[%s2769_s0] sm:$0xf] }
0x1353   :  { %1477 = vmatpush.bf16.msrb.mxu0 %v2451_v35 }
0x13c3   :  { %v1108_v38 = vpop.f32.mrf.mxu1 }
0x13c9   :  { %v2531_v54 = vpop.f32.mrf.mxu3 }
0x13cb   :  { %v1095_v4 = vpop.f32.mrf.mxu0  ;;  %v1110_v50 = vpop.f32.mrf.mxu1 }
0x13cc   :  { %v1109_v56 = vadd.f32 %v1108_v38, %v1095_v4 }
0x13ce   :  { %v1112_v59 = vadd.f32 %v2536_v40, %v1109_v56 }
0x13d0   :  { %v1114_v60 = vrot.slane %v1112_v59, 1  ;;  %v1115_v51 = vperm.slane %v1112_v59, 0 }
0x13d1   :  { %v1078_v61 = vpop.f32.mrf.mxu3 }
0x13d2   :  { %v1116_v62 = vperm.slane %v1114_v60, 0  ;;  %v1119_v35 = vadd.f32 %v2542_v33, %v1115_v51 }
0x13d3   :  { %v1097_v11 = vpop.f32.mrf.mxu0 }
0x13d4   :  { %v1120_v45 = vadd.f32 %v2548_v5, %v1116_v62  ;;  %1945 = vtanh.f32 %v1119_v35 }
0x13d6   :  { %1947 = vtanh.f32 %v1120_v45 }
0x13da   :  { %v1946_v16 = vpop.eup %1945 }
0x13db   :  { %v1123_v19 = vmul.f32 %v2554_v8, %v1946_v16 }
0x13dc   :  { %v1948_v9 = vpop.eup %1947 }
0x13dd   :  { %v1125_v47 = vsel %vm156_vm0, %v1123_v19, 0.0  ;;  %v1124_v12 = vmul.f32 %v2554_v8, %v1948_v9  ;;  %v2585_v19 = vld [vmem:[%s2777_s8] ss:$0 sm:$0xff] }
0x13de   :  { %1126 = vadd.xlane.f32.xlu2 %v1125_v47 }
0x13df   :  { %v1128_v13 = vsel %vm156_vm0, %v1124_v12, 0.0 }
0x13e0   :  { %1129 = vadd.xlane.f32.xlu0 %v1128_v13 }
0x1451   :  { %v1127_v55 = vpop.xlane.xlu2 %1126 }
0x1452   :  { %v1131_v15 = vmul.f32 1.442695, %v1127_v55 }
0x1453   :  { %v1130_v24 = vpop.xlane.xlu0 %1129 }
0x1454   :  { %1949 = vpow2.f32 %v1131_v15  ;;  %v1133_v25 = vmul.f32 1.442695, %v1130_v24 }
0x1456   :  { %1951 = vpow2.f32 %v1133_v25 }
0x145a   :  { %v1950_v26 = vpop.eup %1949 }
0x145b   :  { %v2560_v27 = vmul.f32 %v1950_v26, %v1144_v7  ;;  %v1190_v42 = vperm.slane %v1950_v26, %v2199_v39 }
0x145c   :  { %v1952_v30 = vpop.eup %1951 }
0x145d   :  { %v1156_v36 = vpack.c.bf16 %v2560_v27, %v2560_v27  ;;  %v1191_v46 = vperm.slane %v1952_v30, %v2199_v39  ;;  %v2566_v17 = vmul.f32 %v1952_v30, %v1151_v32 }
0x145f   :  { %v1160_v49 = vunpack.c.l.b16 %v1156_v36  ;;  %v1192_v52 = vsel %vm203_vm1, %v1191_v46, %v1190_v42  ;;  %v1157_v1 = vpack.c.bf16 %v2566_v17, %v2566_v17 }
0x1460   :  { %v1194_v38 = vsel %vm233_vm2, %v1192_v52, 0.0 }
0x1461   :  { %1163 = vperm.xlu1 %1845, %v1160_v49   ;;  %1195 = vadd.xlane.f32.xlu0 %v1194_v38  ;;  %v1161_v4 = vunpack.c.l.b16 %v1157_v1 }
0x1463   :  { %1166 = vperm.xlu2 %1836, %v1161_v4  }
0x146b   :  { %1846 = vset.pattern.permute.xlu2 %v2161_v6 }
0x14bd   :  { %v1167_v50 = vpop.permute.xlu2 %1166 }
0x14be   :  { %v1169_v59 = vperm.slane %v1167_v50, %v2199_v39 }
0x14d3   :  { %v1164_v56 = vpop.permute.xlu1 %1163 }
0x14d4   :  { %v1168_v60 = vperm.slane %v1164_v56, %v2199_v39  ;;  %v1196_v62 = vpop.xlane.xlu0 %1195 }
0x14d5   :  { %1953 = vrcp.f32 %v1196_v62 }
0x14d6   :  { %v1170_v51 = vsel %vm203_vm1, %v1169_v59, %v1168_v60 }
0x14d7   :  { %v1171_v61 = vpack.c.b16 %v1170_v51, %v1170_v51 }
0x14d9   :  { %1802 = vmatmul.msk.bf16.vlgmr.msrb.gmra.mxu2 %vm206_vm4, %v1171_v61 }
0x14da   :  { %1566 = vmatpush.bf16.msrb.mxu2 %v2224_v53 }
0x14db   :  { %v2578_v35 = vpop.eup %1953 }
0x155c   :  { %v1184_v11 = vpop.f32.mrf.mxu2 }
0x155d   :  { %v1211_v45 = vmul.f32 %v2578_v35, %v1184_v11  ;;  %v1807_v11 = vld [vmem:[%s2770_s1 + $0xc] sm:$0x3] }
0x155f   :  { %v1212_v16 = vadd.f32 %v1211_v45, %v2531_v54  ;;  %v1330_v45 = vperm.slane %v1807_v11, 0 }
0x1561   :  { %v1213_v9 = vadd.f32 %v2585_v19, %v1212_v16  ;;  %v1337_v16 = vperm.slane %v1807_v11, 1 }
0x1563   :  { %1955 = vtanh.f32 %v1213_v9  ;;  %v1803_v53 = vmul.f32 -1.442695, %v1213_v9 }
0x1564   :  { %v1186_v47 = vpop.f32.mrf.mxu2 }
0x1565   :  { %1957 = vpow2.f32 %v1803_v53 }
0x1569   :  { %v1956_v12 = vpop.eup %1955 }
0x156a   :  { %1236 = vrot.lane.b32.xlu1 %v1956_v12, %s2063_s18 }
0x156b   :  { %v1958_v13 = vpop.eup %1957 }
0x156c   :  { %v1217_v55 = vadd.f32 1.0, %v1958_v13 }
0x156e   :  { %1959 = vrcp.f32 %v1217_v55  ;;  %v1229_v26 = vand.u32 2147483648, %v1217_v55  ;;  %vm1223_vm6 = vweird.f32 %v1217_v55  ;;  %v1227_v30 = vand.u32 2147483647, %v1217_v55 }
0x1570   :  { %v1230_v36 = vor.u32 1.1754944e-38, %v1229_v26  ;;  %vm1228_vm8 = vcmp.eq.f32.partialorder %v1227_v30, 8.507059e+37 }
0x1574   :  { %v1960_v7 = vpop.eup %1959 }
0x1575   :  { %v1219_v15 = vmul.f32 %v1960_v7, %v1217_v55  ;;  %vm1224_vm5 = vweird.f32 %v1960_v7 }
0x1576   :  { %vm1225_vm7 = vmor %vm1223_vm6, %vm1224_vm5  ;;  %vm1666_vm5 = vcmask 97280   ;;  %vm1668_vm6 = vcmask 130048  }
0x1577   :  { %v1220_v54 = vsub.f32 1.0, %v1219_v15 }
0x1579   :  { %v1221_v24 = vmul.f32 %v1960_v7, %v1220_v54 }
0x157b   :  { %v1222_v25 = vadd.f32 %v1960_v7, %v1221_v24 }
0x157d   :  { %v1226_v32 = vsel %vm1225_vm7, %v1960_v7, %v1222_v25  ;;  %vm1670_vm7 = vcmask 162816  }
0x157e   :  { %v1231_v46 = vsel %vm1228_vm8, %v1230_v36, %v1226_v32  ;;  %vm1672_vm8 = vcmask 195584  }
0x157f   :  { %v1234_v52 = vmul.f32 %v1231_v46, %v2506_v21 }
0x15dc   :  { %v1237_v42 = vpop.permute.xlu1 %1236 }
0x15dd   :  { %v1239_v49 = vmul.f32 %v1237_v42, %v1231_v46 }
0x15df   :  { %1241 = vrot.lane.b32.xlu0 %v1239_v49, %s2064_s19 }
0x1651   :  { %v1242_v1 = vpop.permute.xlu0 %1241 }
0x1652   :  { %v2591_v38 = vadd.f32 %v1242_v1, %v1234_v52 }
0x1654   :  { %1961 = vtanh.f32 %v2591_v38  ;;  %v1252_v4 = vpack.c.bf16 %v2591_v38, %v2591_v38 }
0x1656   :  { %1273 = vrot.lane.b32.xlu2 %v1252_v4, %s2065_s20 }
0x165a   :  { %v1962_v50 = vpop.eup %1961 }
0x165b   :  { %1247 = vrot.lane.b32.xlu1 %v1962_v50, %s2063_s18 }
0x165e   :  { %1335 = vperm.xlu2 %1846, %v1330_v45  }
0x1666   :  { %1342 = vperm.xlu2 %1846, %v1337_v16  }
0x166e   :  { %1847 = vset.pattern.permute.xlu2 %v2062_v3 }
0x16b0   :  { %v1274_v56 = vpop.permute.xlu2 %1273 }
0x16b1   :  { %1805 = vmatmul.msk.bf16.vlgmr.msra.gmra.mxu0 %vm73_vm9, %v1274_v56 }
0x16b8   :  { %v1336_v4 = vpop.permute.xlu2 %1335 }
0x16cd   :  { %v1248_v59 = vpop.permute.xlu1 %1247 }
0x16ce   :  { %v2599_v60 = vmul.f32 %v1248_v59, %v1231_v46 }
0x16d0   :  { %v1251_v21 = vpack.c.bf16 %v2599_v60, %v2599_v60 }
0x16d2   :  { %1254 = vrot.lane.b32.xlu1 %v1251_v21, %s2064_s19 }
0x172e   :  { %v1287_v51 = vpop.f32.mrf.mxu0 }
0x1736   :  { %v1289_v61 = vpop.f32.mrf.mxu0 }
0x1737   :  { %v1343_v61 = vpop.permute.xlu2 %1342 }
0x1744   :  { %v1255_v62 = vpop.permute.xlu1 %1254 }
0x1745   :  { %1804 = vmatmul.msk.bf16.vlgmr.msra.gmra.mxu3 %vm73_vm9, %v1255_v62  ;;  %1806 = vmatmul.msk.bf16.vlgmr.msra.gmra.mxu1 %vm73_vm9, %v1255_v62 }
0x17c2   :  { %v1300_v9 = vpop.f32.mrf.mxu1 }
0x17c3   :  { %v1301_v47 = vadd.f32 %v1300_v9, %v1287_v51 }
0x17c5   :  { %v1304_v12 = vadd.f32 %v2536_v40, %v1301_v47 }
0x17c7   :  { %v1306_v53 = vrot.slane %v1304_v12, 1  ;;  %v1307_v13 = vperm.slane %v1304_v12, 0 }
0x17c8   :  { %v1268_v55 = vpop.f32.mrf.mxu3 }
0x17c9   :  { %v1308_v7 = vperm.slane %v1306_v53, 0  ;;  %v1311_v15 = vadd.f32 %v2542_v33, %v1307_v13 }
0x17ca   :  { %v1302_v54 = vpop.f32.mrf.mxu1 }
0x17cb   :  { %v1312_v24 = vadd.f32 %v2548_v5, %v1308_v7  ;;  %1963 = vtanh.f32 %v1311_v15 }
0x17cd   :  { %1965 = vtanh.f32 %v1312_v24 }
0x17d0   :  { %v1270_v25 = vpop.f32.mrf.mxu3 }
0x17d1   :  { %v1964_v26 = vpop.eup %1963 }
0x17d2   :  { %v1315_v30 = vmul.f32 %v2554_v8, %v1964_v26 }
0x17d3   :  { %v1966_v32 = vpop.eup %1965 }
0x17d4   :  { %v1317_v36 = vsel %vm156_vm0, %v1315_v30, 0.0  ;;  %v1316_v42 = vmul.f32 %v2554_v8, %v1966_v32 }
0x17d5   :  { %1318 = vadd.xlane.f32.xlu0 %v1317_v36 }
0x17d6   :  { %v1320_v46 = vsel %vm156_vm0, %v1316_v42, 0.0 }
0x17d7   :  { %1321 = vadd.xlane.f32.xlu1 %v1320_v46 }
0x1848   :  { %v1319_v49 = vpop.xlane.xlu0 %1318 }
0x1849   :  { %v1323_v52 = vmul.f32 1.442695, %v1319_v49 }
0x184a   :  { %v1322_v1 = vpop.xlane.xlu1 %1321 }
0x184b   :  { %1967 = vpow2.f32 %v1323_v52  ;;  %v1325_v50 = vmul.f32 1.442695, %v1322_v1 }
0x184d   :  { %1969 = vpow2.f32 %v1325_v50 }
0x1851   :  { %v1968_v56 = vpop.eup %1967 }
0x1852   :  { %v2617_v59 = vmul.f32 %v1968_v56, %v1336_v4  ;;  %v1382_v47 = vperm.slane %v1968_v56, %v2199_v39 }
0x1853   :  { %v1970_v21 = vpop.eup %1969 }
0x1854   :  { %v1348_v51 = vpack.c.bf16 %v2617_v59, %v2617_v59  ;;  %v2621_v11 = vmul.f32 %v1970_v21, %v1343_v61  ;;  %v1383_v9 = vperm.slane %v1970_v21, %v2199_v39 }
0x1856   :  { %v1352_v62 = vunpack.c.l.b16 %v1348_v51  ;;  %v1349_v45 = vpack.c.bf16 %v2621_v11, %v2621_v11  ;;  %v1384_v12 = vsel %vm203_vm1, %v1383_v9, %v1382_v47 }
0x1857   :  { %v1386_v53 = vsel %vm233_vm2, %v1384_v12, 0.0 }
0x1858   :  { %1355 = vperm.xlu2 %1847, %v1352_v62   ;;  %v1353_v16 = vunpack.c.l.b16 %v1349_v45 }
0x1860   :  { %1358 = vperm.xlu2 %1847, %v1353_v16  }
0x1868   :  { %1849 = vset.pattern.permute.xlu2 %v2161_v6 }
0x1889   :  { %1387 = vadd.xlane.f32.xlu2 %v1386_v53 }
0x18b2   :  { %v1356_v13 = vpop.permute.xlu2 %1355 }
0x18b3   :  { %v1360_v15 = vperm.slane %v1356_v13, %v2199_v39 }
0x18ba   :  { %v1359_v7 = vpop.permute.xlu2 %1358 }
0x18bb   :  { %v1361_v54 = vperm.slane %v1359_v7, %v2199_v39 }
0x18bd   :  { %v1362_v24 = vsel %vm203_vm1, %v1361_v54, %v1360_v15 }
0x18be   :  { %v1363_v25 = vpack.c.b16 %v1362_v24, %v1362_v24 }
0x18c0   :  { %1808 = vmatmul.msk.bf16.vlgmr.msra.gmra.mxu2 %vm206_vm4, %v1363_v25 }
0x18fc   :  { %v1388_v6 = vpop.xlane.xlu2 %1387 }
0x18fd   :  { %1971 = vrcp.f32 %v1388_v6 }
0x1903   :  { %v2634_v26 = vpop.eup %1971 }
0x1943   :  { %v1376_v30 = vpop.f32.mrf.mxu2 }
0x1944   :  { %v1403_v32 = vmul.f32 %v2634_v26, %v1376_v30 }
0x1946   :  { %v1404_v36 = vadd.f32 %v1403_v32, %v1268_v55 }
0x1948   :  { %v1405_v42 = vadd.f32 %v2585_v19, %v1404_v36 }
0x194a   :  { %1973 = vtanh.f32 %v1405_v42  ;;  %v1809_v52 = vmul.f32 -1.442695, %v1405_v42  ;;  %v1813_v42 = vld [vmem:[%s2770_s1 + $0xe] sm:$0x3]  ;;  %s2066_s1 = smov 4  }
0x194b   :  { %v1378_v46 = vpop.f32.mrf.mxu2 }
0x194c   :  { %1975 = vpow2.f32 %v1809_v52  ;;  %v1522_v46 = vperm.slane %v1813_v42, 0 }
0x1950   :  { %v1974_v49 = vpop.eup %1973 }
0x1951   :  { %1428 = vrot.lane.b32.xlu0 %v1974_v49, %s2063_s18 }
0x1952   :  { %v1976_v1 = vpop.eup %1975 }
0x1953   :  { %v1409_v4 = vadd.f32 1.0, %v1976_v1 }
0x1955   :  { %1977 = vrcp.f32 %v1409_v4  ;;  %v1421_v62 = vand.u32 2147483648, %v1409_v4  ;;  %vm1415_vm11 = vweird.f32 %v1409_v4  ;;  %v1419_v55 = vand.u32 2147483647, %v1409_v4 }
0x1957   :  { %v1422_v16 = vor.u32 1.1754944e-38, %v1421_v62  ;;  %vm1420_vm13 = vcmp.eq.f32.partialorder %v1419_v55, 8.507059e+37 }
0x195b   :  { %v1978_v50 = vpop.eup %1977 }
0x195c   :  { %v1411_v56 = vmul.f32 %v1978_v50, %v1409_v4  ;;  %vm1416_vm10 = vweird.f32 %v1978_v50 }
0x195d   :  { %vm1417_vm12 = vmor %vm1415_vm11, %vm1416_vm10  ;;  %vm1674_vm10 = vcmask 228352   ;;  %vm1676_vm11 = vcmask 254976  }
0x195e   :  { %v1412_v21 = vsub.f32 1.0, %v1411_v56 }
0x1960   :  { %v1413_v51 = vmul.f32 %v1978_v50, %v1412_v21 }
0x1962   :  { %v1414_v61 = vadd.f32 %v1978_v50, %v1413_v51 }
0x1964   :  { %v1418_v45 = vsel %vm1417_vm12, %v1978_v50, %v1414_v61  ;;  %vm1705_vm12 = vcmask 785408  }
0x1965   :  { %v1423_v47 = vsel %vm1420_vm13, %v1422_v16, %v1418_v45 }
0x1966   :  { %v1426_v53 = vmul.f32 %v1423_v47, %v2591_v38 }
0x19c3   :  { %v1429_v9 = vpop.permute.xlu0 %1428 }
0x19c4   :  { %v1431_v12 = vmul.f32 %v1429_v9, %v1423_v47 }
0x19c6   :  { %1433 = vrot.lane.b32.xlu1 %v1431_v12, %s2064_s19 }
0x1a38   :  { %v1434_v13 = vpop.permute.xlu1 %1433 }
0x1a39   :  { %v2641_v7 = vadd.f32 %v1434_v13, %v1426_v53  ;;  %v1529_v53 = vperm.slane %v1813_v42, 1 }
0x1a3b   :  { %1979 = vtanh.f32 %v2641_v7  ;;  %v1444_v54 = vpack.c.bf16 %v2641_v7, %v2641_v7 }
0x1a41   :  { %v1980_v15 = vpop.eup %1979 }
0x1a42   :  { %1439 = vrot.lane.b32.xlu0 %v1980_v15, %s2063_s18 }
0x1a4a   :  { %1465 = vrot.lane.b32.xlu0 %v1444_v54, %s2065_s20 }
0x1a52   :  { %1527 = vperm.xlu0 %1848, %v1522_v46  }
0x1a5a   :  { %1850 = vset.pattern.permute.xlu0 %v2062_v3 }
0x1ab4   :  { %v1440_v24 = vpop.permute.xlu0 %1439 }
0x1ab5   :  { %v2648_v25 = vmul.f32 %v1440_v24, %v1423_v47 }
0x1ab7   :  { %v1443_v6 = vpack.c.bf16 %v2648_v25, %v2648_v25 }
0x1ab9   :  { %1446 = vrot.lane.b32.xlu1 %v1443_v6, %s2064_s19 }
0x1abc   :  { %v1466_v38 = vpop.permute.xlu0 %1465 }
0x1abd   :  { %1811 = vmatmul.msk.bf16.vlgmr.msrb.gmra.mxu0 %vm73_vm9, %v1466_v38 }
0x1ac4   :  { %v1528_v54 = vpop.permute.xlu0 %1527 }
0x1b2b   :  { %v1447_v30 = vpop.permute.xlu1 %1446 }
0x1b2c   :  { %1810 = vmatmul.msk.bf16.vlgmr.msrb.gmra.mxu3 %vm73_vm9, %v1447_v30  ;;  %1812 = vmatmul.msk.bf16.vlgmr.msrb.gmra.mxu1 %vm73_vm9, %v1447_v30 }
0x1b3a   :  { %v1479_v32 = vpop.f32.mrf.mxu0 }
0x1b42   :  { %v1481_v36 = vpop.f32.mrf.mxu0 }
0x1ba9   :  { %v1492_v49 = vpop.f32.mrf.mxu1 }
0x1baa   :  { %v1493_v52 = vadd.f32 %v1492_v49, %v1479_v32 }
0x1bac   :  { %v1496_v1 = vadd.f32 %v2536_v40, %v1493_v52 }
0x1bae   :  { %v1498_v4 = vrot.slane %v1496_v1, 1  ;;  %v1499_v50 = vperm.slane %v1496_v1, 0 }
0x1baf   :  { %v2661_v56 = vpop.f32.mrf.mxu3 }
0x1bb0   :  { %v1500_v21 = vperm.slane %v1498_v4, 0  ;;  %v1503_v51 = vadd.f32 %v2542_v33, %v1499_v50 }
0x1bb1   :  { %v1494_v61 = vpop.f32.mrf.mxu1 }
0x1bb2   :  { %v1504_v62 = vadd.f32 %v2548_v5, %v1500_v21  ;;  %1981 = vtanh.f32 %v1503_v51 }
0x1bb4   :  { %1983 = vtanh.f32 %v1504_v62 }
0x1bb7   :  { %v1462_v55 = vpop.f32.mrf.mxu3 }
0x1bb8   :  { %v1982_v45 = vpop.eup %1981 }
0x1bb9   :  { %v1507_v16 = vmul.f32 %v2554_v8, %v1982_v45 }
0x1bba   :  { %v1984_v9 = vpop.eup %1983 }
0x1bbb   :  { %v1509_v47 = vsel %vm156_vm0, %v1507_v16, 0.0  ;;  %v1508_v40 = vmul.f32 %v2554_v8, %v1984_v9 }
0x1bbc   :  { %1510 = vadd.xlane.f32.xlu2 %v1509_v47 }
0x1bbd   :  { %v1512_v12 = vsel %vm156_vm0, %v1508_v40, 0.0 }
0x1bbe   :  { %1513 = vadd.xlane.f32.xlu1 %v1512_v12 }
0x1bd4   :  { %1534 = vperm.xlu2 %1849, %v1529_v53  }
0x1bd7   :  { %244 = vperm.xlu1 %1845, %v2201_v43  }
0x1bdc   :  { %1851 = vset.pattern.permute.xlu2 %v2062_v3 }
0x1bdf   :  { %628 = vperm.xlu1 %1845, %v2347_v20  }
0x1c2f   :  { %v1511_v33 = vpop.xlane.xlu2 %1510 }
0x1c30   :  { %v1515_v5 = vmul.f32 1.442695, %v1511_v33 }
0x1c31   :  { %v1514_v13 = vpop.xlane.xlu1 %1513 }
0x1c32   :  { %1985 = vpow2.f32 %v1515_v5  ;;  %v1517_v15 = vmul.f32 1.442695, %v1514_v13 }
0x1c34   :  { %1987 = vpow2.f32 %v1517_v15 }
0x1c37   :  { %v1535_v24 = vpop.permute.xlu2 %1534 }
0x1c38   :  { %v1986_v8 = vpop.eup %1985 }
0x1c39   :  { %v1538_v6 = vmul.f32 %v1986_v8, %v1528_v54  ;;  %v1574_v42 = vperm.slane %v1986_v8, %v2199_v39 }
0x1c3a   :  { %v1988_v38 = vpop.eup %1987 }
0x1c3b   :  { %v1540_v30 = vpack.c.bf16 %v1538_v6, %v1538_v6  ;;  %v2672_v32 = vmul.f32 %v1988_v38, %v1535_v24  ;;  %v1575_v20 = vperm.slane %v1988_v38, %v2199_v39 }
0x1c3d   :  { %v1544_v36 = vunpack.c.l.b16 %v1540_v30  ;;  %v1541_v3 = vpack.c.bf16 %v2672_v32, %v2672_v32  ;;  %v1576_v46 = vsel %vm203_vm1, %v1575_v20, %v1574_v42 }
0x1c3e   :  { %v1578_v49 = vsel %vm233_vm2, %v1576_v46, 0.0 }
0x1c3f   :  { %v1545_v43 = vunpack.c.l.b16 %v1541_v3  ;;  %1547 = vperm.xlu0 %1850, %v1544_v36  }
0x1c41   :  { %1550 = vperm.xlu2 %1851, %v1545_v43  }
0x1c49   :  { %241 = vperm.xlu2 %1851, %v2195_v37  }
0x1c51   :  { %433 = vperm.xlu2 %1851, %v2286_v23   ;;  %v245_v23 = vpop.permute.xlu1 %244 }
0x1c59   :  { %436 = vperm.xlu2 %1851, %v2290_v28   ;;  %v629_v30 = vpop.permute.xlu1 %628 }
0x1c61   :  { %625 = vperm.xlu2 %1851, %v2343_v14   ;;  %v247_v14 = vperm.slane %v245_v23, %v2199_v39 }
0x1c69   :  { %817 = vperm.xlu2 %1851, %v2400_v10   ;;  %1579 = vadd.xlane.f32.xlu0 %v1578_v49 }
0x1c71   :  { %1009 = vperm.xlu2 %1851, %v2477_v58  }
0x1c79   :  { %1201 = vperm.xlu2 %1851, %v2560_v27  }
0x1c7d   :  { %820 = vperm.xlu0 %1850, %v2404_v18  }
0x1c81   :  { %1393 = vperm.xlu2 %1851, %v2617_v59  }
0x1c89   :  { %1585 = vperm.xlu2 %1851, %v1538_v6  }
0x1c9b   :  { %v1551_v37 = vpop.permute.xlu2 %1550 }
0x1c9c   :  { %v1553_v58 = vperm.slane %v1551_v37, %v2199_v39 }
0x1ca3   :  { %v242_v28 = vpop.permute.xlu2 %241 }
0x1ca4   :  { %v246_v52 = vperm.slane %v242_v28, %v2199_v39 }
0x1ca6   :  { %v2692_v1 = vsel %vm203_vm1, %v247_v14, %v246_v52 }
0x1cab   :  { %v434_v10 = vpop.permute.xlu2 %433 }
0x1cac   :  { %v438_v59 = vperm.slane %v434_v10, %v2199_v39  ;;  %v631_v10 = vperm.slane %v629_v30, %v2199_v39 }
0x1cb1   :  { %v1548_v4 = vpop.permute.xlu0 %1547 }
0x1cb2   :  { %v1552_v27 = vperm.slane %v1548_v4, %v2199_v39 }
0x1cb3   :  { %v437_v18 = vpop.permute.xlu2 %436 }
0x1cb4   :  { %v1554_v50 = vsel %vm203_vm1, %v1553_v58, %v1552_v27  ;;  %v439_v21 = vperm.slane %v437_v18, %v2199_v39 }
0x1cb5   :  { %v1555_v51 = vpack.c.b16 %v1554_v50, %v1554_v50 }
0x1cb6   :  { %v440_v61 = vsel %vm203_vm1, %v439_v21, %v438_v59 }
0x1cb7   :  { %1814 = vmatmul.msk.bf16.vlgmr.msrb.gmra.mxu2 %vm206_vm4, %v1555_v51  ;;  %v442_v62 = vmul.f32 %v2304_v48, %v440_v61 }
0x1cb9   :  { %1636 = vrot.lane.b32.xlu2 %v442_v62, %s2066_s1 }
0x1cbb   :  { %v626_v48 = vpop.permute.xlu2 %625 }
0x1cbc   :  { %v630_v14 = vperm.slane %v626_v48, %v2199_v39 }
0x1cbe   :  { %v632_v27 = vsel %vm203_vm1, %v631_v10, %v630_v14 }
0x1cbf   :  { %v634_v59 = vmul.f32 %v2361_v44, %v632_v27 }
0x1cc3   :  { %v818_v5 = vpop.permute.xlu2 %817 }
0x1ccb   :  { %v1010_v49 = vpop.permute.xlu2 %1009 }
0x1ccc   :  { %v1014_v23 = vperm.slane %v1010_v49, %v2199_v39 }
0x1cd3   :  { %v1202_v4 = vpop.permute.xlu2 %1201 }
0x1cdb   :  { %v1394_v21 = vpop.permute.xlu2 %1393 }
0x1cdc   :  { %v1580_v55 = vpop.xlane.xlu0 %1579  ;;  %v1398_v62 = vperm.slane %v1394_v21, %v2199_v39 }
0x1cdd   :  { %1989 = vrcp.f32 %v1580_v55 }
0x1ce3   :  { %v2702_v45 = vpop.eup %1989 }
0x1cef   :  { %v821_v33 = vpop.permute.xlu0 %820 }
0x1cf0   :  { %v823_v13 = vperm.slane %v821_v33, %v2199_v39 }
0x1d3a   :  { %v1568_v16 = vpop.f32.mrf.mxu2 }
0x1d3b   :  { %v1595_v9 = vmul.f32 %v2702_v45, %v1568_v16 }
0x1d3d   :  { %v1596_v47 = vadd.f32 %v1595_v9, %v2661_v56  ;;  %v822_v56 = vperm.slane %v818_v5, %v2199_v39 }
0x1d3f   :  { %v1597_v40 = vadd.f32 %v2585_v19, %v1596_v47  ;;  %v824_v19 = vsel %vm203_vm1, %v823_v13, %v822_v56 }
0x1d40   :  { %v826_v15 = vmul.f32 %v2418_v2, %v824_v19 }
0x1d41   :  { %1991 = vtanh.f32 %v1597_v40  ;;  %v1815_v54 = vmul.f32 -1.442695, %v1597_v40  ;;  %v1586_v40 = vpop.permute.xlu2 %1585 }
0x1d42   :  { %v1570_v12 = vpop.f32.mrf.mxu2 }
0x1d43   :  { %1993 = vpow2.f32 %v1815_v54 }
0x1d47   :  { %v1992_v53 = vpop.eup %1991 }
0x1d48   :  { %1620 = vrot.lane.b32.xlu1 %v1992_v53, %s2063_s18  ;;  %v1590_v53 = vperm.slane %v1586_v40, %v2199_v39 }
0x1d50   :  { %1012 = vperm.xlu1 %1845, %v2485_v31   ;;  %v1994_v31 = vpop.eup %1993 }
0x1d51   :  { %v1601_v8 = vadd.f32 1.0, %v1994_v31 }
0x1d53   :  { %1995 = vrcp.f32 %v1601_v8  ;;  %vm1607_vm2 = vweird.f32 %v1601_v8  ;;  %v1611_v3 = vand.u32 2147483647, %v1601_v8 }
0x1d55   :  { %vm1612_vm15 = vcmp.eq.f32.partialorder %v1611_v3, 8.507059e+37 }
0x1d58   :  { %1204 = vperm.xlu1 %1845, %v2566_v17  }
0x1d59   :  { %v1996_v17 = vpop.eup %1995 }
0x1d5a   :  { %v1603_v24 = vmul.f32 %v1996_v17, %v1601_v8  ;;  %vm1608_vm0 = vweird.f32 %v1996_v17 }
0x1d5b   :  { %vm1609_vm14 = vmor %vm1607_vm2, %vm1608_vm0 }
0x1d5c   :  { %v1604_v6 = vsub.f32 1.0, %v1603_v24 }
0x1d5e   :  { %v1605_v38 = vmul.f32 %v1996_v17, %v1604_v6 }
0x1d60   :  { %1396 = vperm.xlu1 %1845, %v2621_v11   ;;  %v1606_v36 = vadd.f32 %v1996_v17, %v1605_v38  ;;  %v1613_v11 = vand.u32 2147483648, %v1601_v8 }
0x1d62   :  { %v1610_v43 = vsel %vm1609_vm14, %v1996_v17, %v1606_v36  ;;  %v1614_v2 = vor.u32 1.1754944e-38, %v1613_v11 }
0x1d64   :  { %v2715_v42 = vsel %vm1612_vm15, %v1614_v2, %v1610_v43 }
0x1d68   :  { %1644 = vrot.lane.b32.xlu1 %v826_v15, %s2067_s12 }
0x1dba   :  { %v1621_v20 = vpop.permute.xlu1 %1620 }
0x1dbb   :  { %v1623_v46 = vmul.f32 %v1621_v20, %v2715_v42 }
0x1dbd   :  { %1625 = vrot.lane.b32.xlu0 %v1623_v46, %s2064_s19 }
0x1dc2   :  { %v1013_v37 = vpop.permute.xlu1 %1012 }
0x1dc3   :  { %v1015_v28 = vperm.slane %v1013_v37, %v2199_v39 }
0x1dc5   :  { %1588 = vperm.xlu0 %1850, %v2672_v32   ;;  %v1016_v52 = vsel %vm203_vm1, %v1015_v28, %v1014_v23  ;;  %v1206_v32 = vperm.slane %v1202_v4, %v2199_v39 }
0x1dc6   :  { %v1018_v58 = vmul.f32 %v2499_v57, %v1016_v52 }
0x1dc8   :  { %1648 = vrot.lane.b32.xlu2 %v1018_v58, %s2068_s13 }
0x1dca   :  { %v1205_v18 = vpop.permute.xlu1 %1204 }
0x1dcb   :  { %v1207_v50 = vperm.slane %v1205_v18, %v2199_v39 }
0x1dcd   :  { %1640 = vrot.lane.b32.xlu0 %v634_v59, %s2069_s14  ;;  %v1208_v51 = vsel %vm203_vm1, %v1207_v50, %v1206_v32 }
0x1dce   :  { %v1210_v55 = vmul.f32 %v2578_v35, %v1208_v51  ;;  %v1618_v35 = vmul.f32 %v2715_v42, %v2641_v7 }
0x1dd2   :  { %v1397_v61 = vpop.permute.xlu1 %1396 }
0x1dd3   :  { %v1399_v57 = vperm.slane %v1397_v61, %v2199_v39 }
0x1dd5   :  { %1652 = vrot.lane.b32.xlu0 %v1210_v55, %s2070_s15  ;;  %v1400_v44 = vsel %vm203_vm1, %v1399_v57, %v1398_v62 }
0x1dd6   :  { %v1402_v16 = vmul.f32 %v2634_v26, %v1400_v44 }
0x1dd8   :  { %1656 = vrot.lane.b32.xlu1 %v1402_v16, %s2071_s16 }
0x1dda   :  { %v1645_v33 = vpop.permute.xlu1 %1644 }
0x1ddd   :  { %1691 = vrot.lane.b32.xlu0 %v2510_v0, %s2064_s19 }
0x1de0   :  { %1695 = vrot.lane.b32.xlu1 %v2599_v60, %s2063_s18 }
0x1de5   :  { %1679 = vrot.lane.b32.xlu0 %v2264_v41, %s2064_s19  ;;  %s2072_s19 = smov 28   ;;  %v1637_v41 = vpop.permute.xlu2 %1636 }
0x1e22   :  { %v1649_v5 = vpop.permute.xlu2 %1648 }
0x1e2f   :  { %v1626_v9 = vpop.permute.xlu0 %1625 }
0x1e30   :  { %v1628_v47 = vadd.f32 %v1626_v9, %v1618_v35 }
0x1e32   :  { %1997 = vtanh.f32 %v1628_v47 }
0x1e37   :  { %v1589_v12 = vpop.permute.xlu0 %1588 }
0x1e38   :  { %v1998_v26 = vpop.eup %1997  ;;  %v1591_v48 = vperm.slane %v1589_v12, %v2199_v39  ;;  %v250_v39 = vmul.f32 %v2243_v63, %v2692_v1 }
0x1e39   :  { %1631 = vrot.lane.b32.xlu1 %v1998_v26, %s2063_s18 }
0x1e3a   :  { %v1592_v0 = vsel %vm203_vm1, %v1591_v48, %v1590_v53  ;;  %vm1664_vm1 = vcmask 64512  }
0x1e3b   :  { %v1594_v60 = vmul.f32 %v2702_v45, %v1592_v0  ;;  %v1663_v45 = vsel %vm206_vm4, %v250_v39, %v1637_v41  ;;  %vm1703_vm4 = vcmask 523264  }
0x1e3d   :  { %1660 = vrot.lane.b32.xlu2 %v1594_v60, %s2072_s19 }
0x1e3f   :  { %v1641_v7 = vpop.permute.xlu0 %1640 }
0x1e40   :  { %v1665_v13 = vsel %vm1664_vm1, %v1663_v45, %v1641_v7 }
0x1e41   :  { %1683 = vrot.lane.b32.xlu1 %v2318_v29, %s2063_s18  ;;  %v1667_v56 = vsel %vm1666_vm5, %v1665_v13, %v1645_v33  ;;  %s2073_s18 = smov [#allocation2]  }
0x1e42   :  { %v1669_v63 = vsel %vm1668_vm6, %v1667_v56, %v1649_v5 }
0x1e45   :  { %1699 = vrot.lane.b32.xlu2 %v2648_v25, %s2065_s20 }
0x1e47   :  { %v1653_v29 = vpop.permute.xlu0 %1652 }
0x1e4a   :  { %v1657_v25 = vpop.permute.xlu1 %1656 }
0x1e4d   :  { %1687 = vrot.lane.b32.xlu2 %v2379_v34, %s2065_s20  ;;  %s1721_s20 = sshll.u32 %s2073_s18, 4  ;;  %v1671_v34 = vsel %vm1670_vm7, %v1669_v63, %v1653_v29  ;;  %s1722_s20 = int_to_ptr.vmem [resolvable:$true] %s1721_s20 }
0x1e4e   :  { %v1673_v1 = vsel %vm1672_vm8, %v1671_v34, %v1657_v25 }
0x1e4f   :  { %v1692_v31 = vpop.permute.xlu0 %1691 }
0x1e52   :  { %v1696_v54 = vpop.permute.xlu1 %1695 }
0x1e53   :  { %v1707_v6 = vsel %vm73_vm9, %v1692_v31, %v1696_v54 }
0x1e57   :  { %v1680_v36 = vpop.permute.xlu0 %1679 }
0x1e97   :  { %v1661_v19 = vpop.permute.xlu2 %1660 }
0x1e98   :  { %v1675_v15 = vsel %vm1674_vm10, %v1673_v1, %v1661_v19 }
0x1e99   :  { %1677 = vst.msk [vmem:[#allocation2] sm:$0x3] %vm1676_vm11, %v1675_v15 }
0x1e9a   :  { %1726 = dma.vmem_to_hbm [thread:$0]  %s1722_s20, 32, %s1724_s6, [#allocation3]  }
0x1e9f   :  { %v1700_v8 = vpop.permute.xlu2 %1699 }
0x1ea0   :  { %v1708_v38 = vsel %vm1703_vm4, %v1707_v6, %v1700_v8 }
0x1ea7   :  { %v1688_v3 = vpop.permute.xlu2 %1687 }
0x1eab   :  { %v1632_v17 = vpop.permute.xlu1 %1631 }
0x1eac   :  { %v1634_v24 = vmul.f32 %v1632_v17, %v2715_v42 }
0x1eae   :  { %v1709_v30 = vsel %vm1705_vm12, %v1708_v38, %v1634_v24 }
0x1eaf   :  { %v1712_v2 = vrot.slane %v1709_v30, 6 }
0x1eb3   :  { %v1684_v11 = vpop.permute.xlu1 %1683 }
0x1eb4   :  { %v1702_v43 = vsel %vm73_vm9, %v1680_v36, %v1684_v11 }
0x1eb5   :  { %v1704_v20 = vsel %vm1703_vm4, %v1702_v43, %v1688_v3 }
0x1eb6   :  { %v1706_v42 = vsel %vm1705_vm12, %v1704_v20, %v2436_v22 }
0x1eb7   :  { %v1713_v46 = vsel %vm210_vm3, %v1706_v42, %v1712_v2 }
0x1eb8   :  { %1715 = vst [vmem:[#allocation4] sm:$0xf] %v1713_v46 }
0x1eb9   :  { %1737 = dma.vmem_to_hbm [thread:$0]  %s1733_s17, 64, %s1735_s23, [#allocation5]  }
0x1eba   :  { %2058 = dma.done.wait [#allocation3], 32  }
0x1ebb   :  { %2059 = vsyncadd [#allocation3], 4294967264 }
0x1ebc   :  { %2060 = dma.done.wait [#allocation5], 64  }
0x1ebd   :  { %2061 = vsyncadd [#allocation5], 4294967232 }
0x1ebe   :  { %1746 = vsyncpa [#allocation3], 1 }
0x1ebf   :  { %1747 = vsyncpa [#allocation5], 1 }

</bundles_post_ra>
